<compile_context>
chip_gen: v7x
topology: tpu7x:2x2x1
jax: 0.10.0
libtpu: 0.0.40
codegen_flags: <defaults>
</compile_context>

<pallas_src>
from functools import partial

import numpy as np
import jax
import jax.numpy as jnp
from jax import lax
from jax.experimental import pallas as pl
from jax.experimental.pallas import tpu as pltpu


# ------------------------- fused forward kernel -----------------------------
def _make_fused_kernel(T, B, H, V, PV):
    """Embedding + bidirectional GRU (two interleaved chains) + streamed decoder."""

    def kernel(ids_ref, gi_tab_ref, whh_f_ref, whh_b_ref,
               bhhn_f_ref, bhhn_b_ref, wdec_f_ref, wdec_b_ref,
               bdec_ref, o_ref):
        # ---- embedding + hoisted input projection (one one-hot matmul) -----
        # gi_all row group i = [fwd gates at t=i (B rows) ; bwd gates at
        # t=T-1-i (B rows)].  Biases (except b_hh_n) already folded into the
        # table rows, so no bias add is needed.
        ids = ids_ref[...]                                        # (T*2B, 1) i32
        iota_v = lax.broadcasted_iota(jnp.int32, (T * 2 * B, 2 * V), 1)
        onehot = (ids == iota_v).astype(jnp.float32)              # (T*2B, 2V)
        gi_all = jnp.dot(onehot, gi_tab_ref[...],
                         preferred_element_type=jnp.float32)      # (T*2B, 3H)

        whh_f = whh_f_ref[...]                                    # (H, 3H)
        whh_b = whh_b_ref[...]                                    # (H, 3H)
        bhhn_f = bhhn_f_ref[...]                                  # (B, H)
        bhhn_b = bhhn_b_ref[...]                                  # (B, H)

        def gates(gi, gh, bhhn, h_prev):
            # Exact tanh-form sigmoid: one EUP op, no exact divide on the chain.
            rz = 0.5 * (jnp.tanh(0.5 * (gi[:, :2 * H] + gh[:, :2 * H])) + 1.0)
            r = rz[:, :H]
            z = rz[:, H:2 * H]
            n = jnp.tanh(gi[:, 2 * H:] + r * (gh[:, 2 * H:] + bhhn))
            return (1.0 - z) * n + z * h_prev                     # (B, H)

        # Python-carried hidden states (opt #2) and streamed-decoder accumulators.
        h_f = jnp.zeros((B, H), jnp.float32)
        h_b = jnp.zeros((B, H), jnp.float32)
        acc_f = jnp.zeros((B, PV), jnp.float32)
        acc_b = jnp.zeros((B, PV), jnp.float32)

        # Fully-unrolled recurrence; two independent direction chains
        # interleaved so their MXU/EUP/VPU phases can overlap.
        for i in range(T):
            base = i * 2 * B
            gi_f = gi_all[base:base + B, :]                       # (B, 3H) static
            gi_b = gi_all[base + B:base + 2 * B, :]               # (B, 3H) static

            gh_f = jnp.dot(h_f, whh_f, preferred_element_type=jnp.float32)
            gh_b = jnp.dot(h_b, whh_b, preferred_element_type=jnp.float32)

            h_f = gates(gi_f, gh_f, bhhn_f, h_f)                  # out_f[i]
            h_b = gates(gi_b, gh_b, bhhn_b, h_b)                  # out_b[T-1-i]

            # Streamed decoder: off the recurrence critical chain.
            acc_f = acc_f + jnp.dot(h_f, wdec_f_ref[i],
                                    preferred_element_type=jnp.float32)
            acc_b = acc_b + jnp.dot(h_b, wdec_b_ref[i],
                                    preferred_element_type=jnp.float32)

        o_ref[...] = acc_f + acc_b + bdec_ref[...]                # (B, P*V)

    return kernel


# --------------------------- parameter packing ------------------------------
def pack_params(emb, gru, w_dec, b_dec, B, T):
    """One-time parameter prep:
       - fold embedding AND all foldable biases into a row-stacked gi table,
       - keep b_hh_n separate (it is multiplied by r), pre-broadcast to (B,H),
       - reorder w_dec into per-(iteration, direction) (H, P*V) slices."""
    H = gru['whh_f'].shape[0]
    PV = w_dec.shape[1]

    def fold_rz(bih, bhh):   # (1, 3H): r/z biases folded, n keeps only b_ih_n
        return jnp.concatenate([bih[:, :2 * H] + bhh[:, :2 * H],
                                bih[:, 2 * H:]], axis=1)

    # Row-stacked table: rows 0:V -> fwd, rows V:2V -> bwd.  Since every
    # one-hot row sums to 1, the (per-direction) folded bias can be added to
    # every table row and disappears from the kernel entirely.
    gi_tab = jnp.concatenate(
        [emb @ gru['wih_f'] + fold_rz(gru['bih_f'], gru['bhh_f']),
         emb @ gru['wih_b'] + fold_rz(gru['bih_b'], gru['bhh_b'])],
        axis=0)                                                   # (2V, 3H)

    bhhn_f = jnp.broadcast_to(gru['bhh_f'][:, 2 * H:], (B, H))
    bhhn_b = jnp.broadcast_to(gru['bhh_b'][:, 2 * H:], (B, H))

    # Decoder rows: flat[b] = [f(0)|b(0)|f(1)|b(1)|...], so w_dec row block
    # t*2H:(t*2H+H) multiplies f(t) and t*2H+H:(t+1)*2H multiplies b(t).
    wd = w_dec.reshape(T, 2, H, PV)
    wdec_f = wd[:, 0]                 # iteration i consumes fwd output at t=i
    wdec_b = wd[::-1, 1]              # iteration i consumes bwd output at t=T-1-i
    b_dec_b = jnp.broadcast_to(b_dec, (B, PV))

    return dict(gi_tab=gi_tab, whh_f=gru['whh_f'], whh_b=gru['whh_b'],
                bhhn_f=bhhn_f, bhhn_b=bhhn_b,
                wdec_f=wdec_f, wdec_b=wdec_b, b_dec=b_dec_b)


# ------------------------------ forward -------------------------------------
@partial(jax.jit, static_argnames=("T", "B", "H", "P", "V"))
def forward(input_ids, packed, *, T, B, H, P, V):
    PV = P * V
    # Fused per-step id layout (tiny int32 glue; everything heavy is inside
    # the single fused kernel):
    #   row i*2B + b     = ids[b, i]            (fwd step i)
    #   row i*2B + B + b = ids[b, T-1-i] + V    (bwd step processed at iter i)
    ids_f = jnp.transpose(input_ids, (1, 0)).astype(jnp.int32)        # (T, B)
    ids_b = ids_f[::-1] + V                                           # (T, B)
    ids_fused = jnp.stack([ids_f, ids_b], axis=1).reshape(T * 2 * B, 1)

    vmem = pl.BlockSpec(memory_space=pltpu.MemorySpace.VMEM)
    flops = (2 * (T * 2 * B) * (2 * V) * (3 * H)        # one-hot input projection
             + T * 2 * (2 * B * H * (3 * H))            # recurrence (2 chains)
             + T * 2 * (2 * B * H * PV))                # streamed decoder
    transcendentals = T * 2 * B * (3 * H)
    bytes_accessed = 4 * (T * 2 * B + 2 * V * 3 * H + 2 * (H * 3 * H)
                          + 2 * (B * H) + 2 * (T * H * PV)
                          + B * PV + B * PV)

    logits = pl.pallas_call(
        _make_fused_kernel(T, B, H, V, PV),
        out_shape=jax.ShapeDtypeStruct((B, PV), jnp.float32),
        in_specs=[vmem] * 9,
        out_specs=vmem,
        cost_estimate=pl.CostEstimate(flops=flops,
                                      transcendentals=transcendentals,
                                      bytes_accessed=bytes_accessed),
    )(ids_fused, packed['gi_tab'], packed['whh_f'], packed['whh_b'],
      packed['bhhn_f'], packed['bhhn_b'], packed['wdec_f'], packed['wdec_b'],
      packed['b_dec'])
    return logits.reshape(B, P, V)


# --------------------------- pure-JAX reference -----------------------------
def _gru_dir_ref(x_tbe, wih, whh, bih, bhh):
    H = whh.shape[0]

    def step(h, x_t):
        gi = x_t @ wih + bih
        gh = h @ whh + bhh
        r = jax.nn.sigmoid(gi[:, :H] + gh[:, :H])
        z = jax.nn.sigmoid(gi[:, H:2 * H] + gh[:, H:2 * H])
        n = jnp.tanh(gi[:, 2 * H:] + r * gh[:, 2 * H:])
        h_new = (1.0 - z) * n + z * h
        return h_new, h_new

    h0 = jnp.zeros((x_tbe.shape[1], H), jnp.float32)
    _, ys = lax.scan(step, h0, x_tbe)
    return ys


def forward_ref(input_ids, emb, p, w_dec, b_dec, output_padding, vocab_size):
    x = emb[input_ids]
    x_tbe = jnp.transpose(x, (1, 0, 2))
    out_f = _gru_dir_ref(x_tbe, p['wih_f'], p['whh_f'], p['bih_f'], p['bhh_f'])
    out_b = _gru_dir_ref(x_tbe[::-1], p['wih_b'], p['whh_b'],
                         p['bih_b'], p['bhh_b'])[::-1]
    raw = jnp.transpose(jnp.concatenate([out_f, out_b], axis=-1), (1, 0, 2))
    flat = raw.reshape(raw.shape[0], -1)
    logits = flat @ w_dec + b_dec
    return logits.reshape(raw.shape[0], output_padding, vocab_size)


# --------------------------------- main --------------------------------------
if __name__ == "__main__":
    batch_size = 4
    input_padding = 8          # sequence length T
    embedding_dimension = 16   # E
    hidden_size = 32           # H
    vocab_size = 16            # V (tokenizer.get_len)
    output_padding = 4         # P
    n_layers = 1

    key = jax.random.PRNGKey(0)
    keys = jax.random.split(key, 12)

    def uni(k_, shape, bound):
        return jax.random.uniform(k_, shape, jnp.float32, -bound, bound)

    # Embedding ~ N(0, 1) (PyTorch default).
    emb = jax.random.normal(keys[0], (vocab_size, embedding_dimension), jnp.float32)

    # GRU weights kept transposed vs PyTorch: (E, 3H) / (H, 3H); gate order r,z,n.
    kb = 1.0 / np.sqrt(hidden_size)
    gru_params = {
        'wih_f': uni(keys[1], (embedding_dimension, 3 * hidden_size), kb),
        'whh_f': uni(keys[2], (hidden_size, 3 * hidden_size), kb),
        'bih_f': uni(keys[3], (1, 3 * hidden_size), kb),
        'bhh_f': uni(keys[4], (1, 3 * hidden_size), kb),
        'wih_b': uni(keys[5], (embedding_dimension, 3 * hidden_size), kb),
        'whh_b': uni(keys[6], (hidden_size, 3 * hidden_size), kb),
        'bih_b': uni(keys[7], (1, 3 * hidden_size), kb),
        'bhh_b': uni(keys[8], (1, 3 * hidden_size), kb),
    }

    dec_in = hidden_size * input_padding * n_layers * 2
    dec_out = output_padding * vocab_size
    kd = 1.0 / np.sqrt(dec_in)
    w_dec = uni(keys[9], (dec_in, dec_out), kd)   # transposed vs PyTorch (out, in)
    b_dec = uni(keys[10], (1, dec_out), kd)

    input_ids = jax.random.randint(keys[11], (batch_size, input_padding),
                                   0, vocab_size, dtype=jnp.int32)

    packed = pack_params(emb, gru_params, w_dec, b_dec, batch_size, input_padding)

    out = forward(input_ids, packed,
                  T=input_padding, B=batch_size, H=hidden_size,
                  P=output_padding, V=vocab_size)
    out = jax.block_until_ready(out)
    assert out.shape == (batch_size, output_padding, vocab_size)

    ref = forward_ref(input_ids, emb, gru_params, w_dec, b_dec,
                      output_padding, vocab_size)
    np.testing.assert_allclose(np.asarray(out), np.asarray(ref),
                               rtol=1e-3, atol=1e-3)
    print("KERNEL_OK")
</pallas_src>

<mosaic_0001>
module attributes {stable_mosaic.version = 11 : i64} {
  func.func @kernel(%arg0: memref<64x1xi32, #tpu.memory_space<vmem>>, %arg1: memref<32x96xf32, #tpu.memory_space<vmem>>, %arg2: memref<32x96xf32, #tpu.memory_space<vmem>>, %arg3: memref<32x96xf32, #tpu.memory_space<vmem>>, %arg4: memref<4x32xf32, #tpu.memory_space<vmem>>, %arg5: memref<4x32xf32, #tpu.memory_space<vmem>>, %arg6: memref<8x32x64xf32, #tpu.memory_space<vmem>>, %arg7: memref<8x32x64xf32, #tpu.memory_space<vmem>>, %arg8: memref<4x64xf32, #tpu.memory_space<vmem>>, %arg9: memref<4x64xf32, #tpu.memory_space<vmem>>) attributes {dimension_semantics = [], scalar_prefetch = 0 : i64, scratch_operands = 0 : i64, tpu.core_type = #tpu.core_type<tc>} {
    %c0 = arith.constant 0 : index
    %c0_0 = arith.constant 0 : index
    %0 = vector.load %arg0[%c0, %c0_0] : memref<64x1xi32, #tpu.memory_space<vmem>>, vector<64x1xi32>
    %1 = tpu.iota {dimensions = array<i32: 1>} : vector<64x32xi32>
    %2 = vector.broadcast %0 : vector<64x1xi32> to vector<64x32xi32>
    %3 = arith.cmpi eq, %2, %1 : vector<64x32xi32>
    %4 = arith.extui %3 : vector<64x32xi1> to vector<64x32xi32>
    %5 = arith.sitofp %4 : vector<64x32xi32> to vector<64x32xf32>
    %c0_1 = arith.constant 0 : index
    %c0_2 = arith.constant 0 : index
    %6 = vector.load %arg1[%c0_1, %c0_2] : memref<32x96xf32, #tpu.memory_space<vmem>>, vector<32x96xf32>
    %cst = arith.constant dense<0.000000e+00> : vector<64x96xf32>
    %7 = tpu.matmul %5, %6, %cst {dimension_numbers = #tpu.dot_dimension_numbers<[1], [0], [0], [1], [0, 0, 1, 1], [], []>} : vector<64x32xf32>, vector<32x96xf32>, vector<64x96xf32> -> vector<64x96xf32>
    %c0_3 = arith.constant 0 : index
    %c0_4 = arith.constant 0 : index
    %8 = vector.load %arg2[%c0_3, %c0_4] : memref<32x96xf32, #tpu.memory_space<vmem>>, vector<32x96xf32>
    %c0_5 = arith.constant 0 : index
    %c0_6 = arith.constant 0 : index
    %9 = vector.load %arg3[%c0_5, %c0_6] : memref<32x96xf32, #tpu.memory_space<vmem>>, vector<32x96xf32>
    %c0_7 = arith.constant 0 : index
    %c0_8 = arith.constant 0 : index
    %10 = vector.load %arg4[%c0_7, %c0_8] : memref<4x32xf32, #tpu.memory_space<vmem>>, vector<4x32xf32>
    %c0_9 = arith.constant 0 : index
    %c0_10 = arith.constant 0 : index
    %11 = vector.load %arg5[%c0_9, %c0_10] : memref<4x32xf32, #tpu.memory_space<vmem>>, vector<4x32xf32>
    %cst_11 = arith.constant 0.000000e+00 : f32
    %12 = vector.broadcast %cst_11 : f32 to vector<4x32xf32>
    %cst_12 = arith.constant 0.000000e+00 : f32
    %13 = vector.broadcast %cst_12 : f32 to vector<4x32xf32>
    %cst_13 = arith.constant 0.000000e+00 : f32
    %14 = vector.broadcast %cst_13 : f32 to vector<4x64xf32>
    %cst_14 = arith.constant 0.000000e+00 : f32
    %15 = vector.broadcast %cst_14 : f32 to vector<4x64xf32>
    %16 = vector.extract_strided_slice %7 {offsets = [0, 0], sizes = [4, 96], strides = [1, 1]} : vector<64x96xf32> to vector<4x96xf32>
    %17 = vector.extract_strided_slice %7 {offsets = [4, 0], sizes = [4, 96], strides = [1, 1]} : vector<64x96xf32> to vector<4x96xf32>
    %cst_15 = arith.constant dense<0.000000e+00> : vector<4x96xf32>
    %18 = tpu.matmul %12, %8, %cst_15 {dimension_numbers = #tpu.dot_dimension_numbers<[1], [0], [0], [1], [0, 0, 1, 1], [], []>} : vector<4x32xf32>, vector<32x96xf32>, vector<4x96xf32> -> vector<4x96xf32>
    %cst_16 = arith.constant dense<0.000000e+00> : vector<4x96xf32>
    %19 = tpu.matmul %13, %9, %cst_16 {dimension_numbers = #tpu.dot_dimension_numbers<[1], [0], [0], [1], [0, 0, 1, 1], [], []>} : vector<4x32xf32>, vector<32x96xf32>, vector<4x96xf32> -> vector<4x96xf32>
    %20 = vector.extract_strided_slice %16 {offsets = [0, 0], sizes = [4, 64], strides = [1, 1]} : vector<4x96xf32> to vector<4x64xf32>
    %21 = vector.extract_strided_slice %18 {offsets = [0, 0], sizes = [4, 64], strides = [1, 1]} : vector<4x96xf32> to vector<4x64xf32>
    %22 = arith.addf %20, %21 : vector<4x64xf32>
    %cst_17 = arith.constant 5.000000e-01 : f32
    %23 = vector.broadcast %cst_17 : f32 to vector<4x64xf32>
    %24 = arith.mulf %23, %22 : vector<4x64xf32>
    %25 = math.tanh %24 : vector<4x64xf32>
    %cst_18 = arith.constant 1.000000e+00 : f32
    %26 = vector.broadcast %cst_18 : f32 to vector<4x64xf32>
    %27 = arith.addf %25, %26 : vector<4x64xf32>
    %cst_19 = arith.constant 5.000000e-01 : f32
    %28 = vector.broadcast %cst_19 : f32 to vector<4x64xf32>
    %29 = arith.mulf %28, %27 : vector<4x64xf32>
    %30 = vector.extract_strided_slice %29 {offsets = [0, 0], sizes = [4, 32], strides = [1, 1]} : vector<4x64xf32> to vector<4x32xf32>
    %31 = vector.extract_strided_slice %29 {offsets = [0, 32], sizes = [4, 32], strides = [1, 1]} : vector<4x64xf32> to vector<4x32xf32>
    %32 = vector.extract_strided_slice %16 {offsets = [0, 64], sizes = [4, 32], strides = [1, 1]} : vector<4x96xf32> to vector<4x32xf32>
    %33 = vector.extract_strided_slice %18 {offsets = [0, 64], sizes = [4, 32], strides = [1, 1]} : vector<4x96xf32> to vector<4x32xf32>
    %34 = arith.addf %33, %10 : vector<4x32xf32>
    %35 = arith.mulf %30, %34 : vector<4x32xf32>
    %36 = arith.addf %32, %35 : vector<4x32xf32>
    %37 = math.tanh %36 : vector<4x32xf32>
    %cst_20 = arith.constant 1.000000e+00 : f32
    %38 = vector.broadcast %cst_20 : f32 to vector<4x32xf32>
    %39 = arith.subf %38, %31 : vector<4x32xf32>
    %40 = arith.mulf %39, %37 : vector<4x32xf32>
    %41 = arith.mulf %31, %12 : vector<4x32xf32>
    %42 = arith.addf %40, %41 : vector<4x32xf32>
    %43 = vector.extract_strided_slice %17 {offsets = [0, 0], sizes = [4, 64], strides = [1, 1]} : vector<4x96xf32> to vector<4x64xf32>
    %44 = vector.extract_strided_slice %19 {offsets = [0, 0], sizes = [4, 64], strides = [1, 1]} : vector<4x96xf32> to vector<4x64xf32>
    %45 = arith.addf %43, %44 : vector<4x64xf32>
    %cst_21 = arith.constant 5.000000e-01 : f32
    %46 = vector.broadcast %cst_21 : f32 to vector<4x64xf32>
    %47 = arith.mulf %46, %45 : vector<4x64xf32>
    %48 = math.tanh %47 : vector<4x64xf32>
    %cst_22 = arith.constant 1.000000e+00 : f32
    %49 = vector.broadcast %cst_22 : f32 to vector<4x64xf32>
    %50 = arith.addf %48, %49 : vector<4x64xf32>
    %cst_23 = arith.constant 5.000000e-01 : f32
    %51 = vector.broadcast %cst_23 : f32 to vector<4x64xf32>
    %52 = arith.mulf %51, %50 : vector<4x64xf32>
    %53 = vector.extract_strided_slice %52 {offsets = [0, 0], sizes = [4, 32], strides = [1, 1]} : vector<4x64xf32> to vector<4x32xf32>
    %54 = vector.extract_strided_slice %52 {offsets = [0, 32], sizes = [4, 32], strides = [1, 1]} : vector<4x64xf32> to vector<4x32xf32>
    %55 = vector.extract_strided_slice %17 {offsets = [0, 64], sizes = [4, 32], strides = [1, 1]} : vector<4x96xf32> to vector<4x32xf32>
    %56 = vector.extract_strided_slice %19 {offsets = [0, 64], sizes = [4, 32], strides = [1, 1]} : vector<4x96xf32> to vector<4x32xf32>
    %57 = arith.addf %56, %11 : vector<4x32xf32>
    %58 = arith.mulf %53, %57 : vector<4x32xf32>
    %59 = arith.addf %55, %58 : vector<4x32xf32>
    %60 = math.tanh %59 : vector<4x32xf32>
    %cst_24 = arith.constant 1.000000e+00 : f32
    %61 = vector.broadcast %cst_24 : f32 to vector<4x32xf32>
    %62 = arith.subf %61, %54 : vector<4x32xf32>
    %63 = arith.mulf %62, %60 : vector<4x32xf32>
    %64 = arith.mulf %54, %13 : vector<4x32xf32>
    %65 = arith.addf %63, %64 : vector<4x32xf32>
    %c0_25 = arith.constant 0 : index
    %c0_26 = arith.constant 0 : index
    %c0_27 = arith.constant 0 : index
    %66 = vector.load %arg6[%c0_25, %c0_26, %c0_27] : memref<8x32x64xf32, #tpu.memory_space<vmem>>, vector<1x32x64xf32>
    %67 = vector.shape_cast %66 : vector<1x32x64xf32> to vector<32x64xf32>
    %cst_28 = arith.constant dense<0.000000e+00> : vector<4x64xf32>
    %68 = tpu.matmul %42, %67, %cst_28 {dimension_numbers = #tpu.dot_dimension_numbers<[1], [0], [0], [1], [0, 0, 1, 1], [], []>} : vector<4x32xf32>, vector<32x64xf32>, vector<4x64xf32> -> vector<4x64xf32>
    %69 = arith.addf %14, %68 : vector<4x64xf32>
    %c0_29 = arith.constant 0 : index
    %c0_30 = arith.constant 0 : index
    %c0_31 = arith.constant 0 : index
    %70 = vector.load %arg7[%c0_29, %c0_30, %c0_31] : memref<8x32x64xf32, #tpu.memory_space<vmem>>, vector<1x32x64xf32>
    %71 = vector.shape_cast %70 : vector<1x32x64xf32> to vector<32x64xf32>
    %cst_32 = arith.constant dense<0.000000e+00> : vector<4x64xf32>
    %72 = tpu.matmul %65, %71, %cst_32 {dimension_numbers = #tpu.dot_dimension_numbers<[1], [0], [0], [1], [0, 0, 1, 1], [], []>} : vector<4x32xf32>, vector<32x64xf32>, vector<4x64xf32> -> vector<4x64xf32>
    %73 = arith.addf %15, %72 : vector<4x64xf32>
    %74 = vector.extract_strided_slice %7 {offsets = [8, 0], sizes = [4, 96], strides = [1, 1]} : vector<64x96xf32> to vector<4x96xf32>
    %75 = vector.extract_strided_slice %7 {offsets = [12, 0], sizes = [4, 96], strides = [1, 1]} : vector<64x96xf32> to vector<4x96xf32>
    %cst_33 = arith.constant dense<0.000000e+00> : vector<4x96xf32>
    %76 = tpu.matmul %42, %8, %cst_33 {dimension_numbers = #tpu.dot_dimension_numbers<[1], [0], [0], [1], [0, 0, 1, 1], [], []>} : vector<4x32xf32>, vector<32x96xf32>, vector<4x96xf32> -> vector<4x96xf32>
    %cst_34 = arith.constant dense<0.000000e+00> : vector<4x96xf32>
    %77 = tpu.matmul %65, %9, %cst_34 {dimension_numbers = #tpu.dot_dimension_numbers<[1], [0], [0], [1], [0, 0, 1, 1], [], []>} : vector<4x32xf32>, vector<32x96xf32>, vector<4x96xf32> -> vector<4x96xf32>
    %78 = vector.extract_strided_slice %74 {offsets = [0, 0], sizes = [4, 64], strides = [1, 1]} : vector<4x96xf32> to vector<4x64xf32>
    %79 = vector.extract_strided_slice %76 {offsets = [0, 0], sizes = [4, 64], strides = [1, 1]} : vector<4x96xf32> to vector<4x64xf32>
    %80 = arith.addf %78, %79 : vector<4x64xf32>
    %cst_35 = arith.constant 5.000000e-01 : f32
    %81 = vector.broadcast %cst_35 : f32 to vector<4x64xf32>
    %82 = arith.mulf %81, %80 : vector<4x64xf32>
    %83 = math.tanh %82 : vector<4x64xf32>
    %cst_36 = arith.constant 1.000000e+00 : f32
    %84 = vector.broadcast %cst_36 : f32 to vector<4x64xf32>
    %85 = arith.addf %83, %84 : vector<4x64xf32>
    %cst_37 = arith.constant 5.000000e-01 : f32
    %86 = vector.broadcast %cst_37 : f32 to vector<4x64xf32>
    %87 = arith.mulf %86, %85 : vector<4x64xf32>
    %88 = vector.extract_strided_slice %87 {offsets = [0, 0], sizes = [4, 32], strides = [1, 1]} : vector<4x64xf32> to vector<4x32xf32>
    %89 = vector.extract_strided_slice %87 {offsets = [0, 32], sizes = [4, 32], strides = [1, 1]} : vector<4x64xf32> to vector<4x32xf32>
    %90 = vector.extract_strided_slice %74 {offsets = [0, 64], sizes = [4, 32], strides = [1, 1]} : vector<4x96xf32> to vector<4x32xf32>
    %91 = vector.extract_strided_slice %76 {offsets = [0, 64], sizes = [4, 32], strides = [1, 1]} : vector<4x96xf32> to vector<4x32xf32>
    %92 = arith.addf %91, %10 : vector<4x32xf32>
    %93 = arith.mulf %88, %92 : vector<4x32xf32>
    %94 = arith.addf %90, %93 : vector<4x32xf32>
    %95 = math.tanh %94 : vector<4x32xf32>
    %cst_38 = arith.constant 1.000000e+00 : f32
    %96 = vector.broadcast %cst_38 : f32 to vector<4x32xf32>
    %97 = arith.subf %96, %89 : vector<4x32xf32>
    %98 = arith.mulf %97, %95 : vector<4x32xf32>
    %99 = arith.mulf %89, %42 : vector<4x32xf32>
    %100 = arith.addf %98, %99 : vector<4x32xf32>
    %101 = vector.extract_strided_slice %75 {offsets = [0, 0], sizes = [4, 64], strides = [1, 1]} : vector<4x96xf32> to vector<4x64xf32>
    %102 = vector.extract_strided_slice %77 {offsets = [0, 0], sizes = [4, 64], strides = [1, 1]} : vector<4x96xf32> to vector<4x64xf32>
    %103 = arith.addf %101, %102 : vector<4x64xf32>
    %cst_39 = arith.constant 5.000000e-01 : f32
    %104 = vector.broadcast %cst_39 : f32 to vector<4x64xf32>
    %105 = arith.mulf %104, %103 : vector<4x64xf32>
    %106 = math.tanh %105 : vector<4x64xf32>
    %cst_40 = arith.constant 1.000000e+00 : f32
    %107 = vector.broadcast %cst_40 : f32 to vector<4x64xf32>
    %108 = arith.addf %106, %107 : vector<4x64xf32>
    %cst_41 = arith.constant 5.000000e-01 : f32
    %109 = vector.broadcast %cst_41 : f32 to vector<4x64xf32>
    %110 = arith.mulf %109, %108 : vector<4x64xf32>
    %111 = vector.extract_strided_slice %110 {offsets = [0, 0], sizes = [4, 32], strides = [1, 1]} : vector<4x64xf32> to vector<4x32xf32>
    %112 = vector.extract_strided_slice %110 {offsets = [0, 32], sizes = [4, 32], strides = [1, 1]} : vector<4x64xf32> to vector<4x32xf32>
    %113 = vector.extract_strided_slice %75 {offsets = [0, 64], sizes = [4, 32], strides = [1, 1]} : vector<4x96xf32> to vector<4x32xf32>
    %114 = vector.extract_strided_slice %77 {offsets = [0, 64], sizes = [4, 32], strides = [1, 1]} : vector<4x96xf32> to vector<4x32xf32>
    %115 = arith.addf %114, %11 : vector<4x32xf32>
    %116 = arith.mulf %111, %115 : vector<4x32xf32>
    %117 = arith.addf %113, %116 : vector<4x32xf32>
    %118 = math.tanh %117 : vector<4x32xf32>
    %cst_42 = arith.constant 1.000000e+00 : f32
    %119 = vector.broadcast %cst_42 : f32 to vector<4x32xf32>
    %120 = arith.subf %119, %112 : vector<4x32xf32>
    %121 = arith.mulf %120, %118 : vector<4x32xf32>
    %122 = arith.mulf %112, %65 : vector<4x32xf32>
    %123 = arith.addf %121, %122 : vector<4x32xf32>
    %c1 = arith.constant 1 : index
    %c0_43 = arith.constant 0 : index
    %c0_44 = arith.constant 0 : index
    %124 = vector.load %arg6[%c1, %c0_43, %c0_44] : memref<8x32x64xf32, #tpu.memory_space<vmem>>, vector<1x32x64xf32>
    %125 = vector.shape_cast %124 : vector<1x32x64xf32> to vector<32x64xf32>
    %cst_45 = arith.constant dense<0.000000e+00> : vector<4x64xf32>
    %126 = tpu.matmul %100, %125, %cst_45 {dimension_numbers = #tpu.dot_dimension_numbers<[1], [0], [0], [1], [0, 0, 1, 1], [], []>} : vector<4x32xf32>, vector<32x64xf32>, vector<4x64xf32> -> vector<4x64xf32>
    %127 = arith.addf %69, %126 : vector<4x64xf32>
    %c1_46 = arith.constant 1 : index
    %c0_47 = arith.constant 0 : index
    %c0_48 = arith.constant 0 : index
    %128 = vector.load %arg7[%c1_46, %c0_47, %c0_48] : memref<8x32x64xf32, #tpu.memory_space<vmem>>, vector<1x32x64xf32>
    %129 = vector.shape_cast %128 : vector<1x32x64xf32> to vector<32x64xf32>
    %cst_49 = arith.constant dense<0.000000e+00> : vector<4x64xf32>
    %130 = tpu.matmul %123, %129, %cst_49 {dimension_numbers = #tpu.dot_dimension_numbers<[1], [0], [0], [1], [0, 0, 1, 1], [], []>} : vector<4x32xf32>, vector<32x64xf32>, vector<4x64xf32> -> vector<4x64xf32>
    %131 = arith.addf %73, %130 : vector<4x64xf32>
    %132 = vector.extract_strided_slice %7 {offsets = [16, 0], sizes = [4, 96], strides = [1, 1]} : vector<64x96xf32> to vector<4x96xf32>
    %133 = vector.extract_strided_slice %7 {offsets = [20, 0], sizes = [4, 96], strides = [1, 1]} : vector<64x96xf32> to vector<4x96xf32>
    %cst_50 = arith.constant dense<0.000000e+00> : vector<4x96xf32>
    %134 = tpu.matmul %100, %8, %cst_50 {dimension_numbers = #tpu.dot_dimension_numbers<[1], [0], [0], [1], [0, 0, 1, 1], [], []>} : vector<4x32xf32>, vector<32x96xf32>, vector<4x96xf32> -> vector<4x96xf32>
    %cst_51 = arith.constant dense<0.000000e+00> : vector<4x96xf32>
    %135 = tpu.matmul %123, %9, %cst_51 {dimension_numbers = #tpu.dot_dimension_numbers<[1], [0], [0], [1], [0, 0, 1, 1], [], []>} : vector<4x32xf32>, vector<32x96xf32>, vector<4x96xf32> -> vector<4x96xf32>
    %136 = vector.extract_strided_slice %132 {offsets = [0, 0], sizes = [4, 64], strides = [1, 1]} : vector<4x96xf32> to vector<4x64xf32>
    %137 = vector.extract_strided_slice %134 {offsets = [0, 0], sizes = [4, 64], strides = [1, 1]} : vector<4x96xf32> to vector<4x64xf32>
    %138 = arith.addf %136, %137 : vector<4x64xf32>
    %cst_52 = arith.constant 5.000000e-01 : f32
    %139 = vector.broadcast %cst_52 : f32 to vector<4x64xf32>
    %140 = arith.mulf %139, %138 : vector<4x64xf32>
    %141 = math.tanh %140 : vector<4x64xf32>
    %cst_53 = arith.constant 1.000000e+00 : f32
    %142 = vector.broadcast %cst_53 : f32 to vector<4x64xf32>
    %143 = arith.addf %141, %142 : vector<4x64xf32>
    %cst_54 = arith.constant 5.000000e-01 : f32
    %144 = vector.broadcast %cst_54 : f32 to vector<4x64xf32>
    %145 = arith.mulf %144, %143 : vector<4x64xf32>
    %146 = vector.extract_strided_slice %145 {offsets = [0, 0], sizes = [4, 32], strides = [1, 1]} : vector<4x64xf32> to vector<4x32xf32>
    %147 = vector.extract_strided_slice %145 {offsets = [0, 32], sizes = [4, 32], strides = [1, 1]} : vector<4x64xf32> to vector<4x32xf32>
    %148 = vector.extract_strided_slice %132 {offsets = [0, 64], sizes = [4, 32], strides = [1, 1]} : vector<4x96xf32> to vector<4x32xf32>
    %149 = vector.extract_strided_slice %134 {offsets = [0, 64], sizes = [4, 32], strides = [1, 1]} : vector<4x96xf32> to vector<4x32xf32>
    %150 = arith.addf %149, %10 : vector<4x32xf32>
    %151 = arith.mulf %146, %150 : vector<4x32xf32>
    %152 = arith.addf %148, %151 : vector<4x32xf32>
    %153 = math.tanh %152 : vector<4x32xf32>
    %cst_55 = arith.constant 1.000000e+00 : f32
    %154 = vector.broadcast %cst_55 : f32 to vector<4x32xf32>
    %155 = arith.subf %154, %147 : vector<4x32xf32>
    %156 = arith.mulf %155, %153 : vector<4x32xf32>
    %157 = arith.mulf %147, %100 : vector<4x32xf32>
    %158 = arith.addf %156, %157 : vector<4x32xf32>
    %159 = vector.extract_strided_slice %133 {offsets = [0, 0], sizes = [4, 64], strides = [1, 1]} : vector<4x96xf32> to vector<4x64xf32>
    %160 = vector.extract_strided_slice %135 {offsets = [0, 0], sizes = [4, 64], strides = [1, 1]} : vector<4x96xf32> to vector<4x64xf32>
    %161 = arith.addf %159, %160 : vector<4x64xf32>
    %cst_56 = arith.constant 5.000000e-01 : f32
    %162 = vector.broadcast %cst_56 : f32 to vector<4x64xf32>
    %163 = arith.mulf %162, %161 : vector<4x64xf32>
    %164 = math.tanh %163 : vector<4x64xf32>
    %cst_57 = arith.constant 1.000000e+00 : f32
    %165 = vector.broadcast %cst_57 : f32 to vector<4x64xf32>
    %166 = arith.addf %164, %165 : vector<4x64xf32>
    %cst_58 = arith.constant 5.000000e-01 : f32
    %167 = vector.broadcast %cst_58 : f32 to vector<4x64xf32>
    %168 = arith.mulf %167, %166 : vector<4x64xf32>
    %169 = vector.extract_strided_slice %168 {offsets = [0, 0], sizes = [4, 32], strides = [1, 1]} : vector<4x64xf32> to vector<4x32xf32>
    %170 = vector.extract_strided_slice %168 {offsets = [0, 32], sizes = [4, 32], strides = [1, 1]} : vector<4x64xf32> to vector<4x32xf32>
    %171 = vector.extract_strided_slice %133 {offsets = [0, 64], sizes = [4, 32], strides = [1, 1]} : vector<4x96xf32> to vector<4x32xf32>
    %172 = vector.extract_strided_slice %135 {offsets = [0, 64], sizes = [4, 32], strides = [1, 1]} : vector<4x96xf32> to vector<4x32xf32>
    %173 = arith.addf %172, %11 : vector<4x32xf32>
    %174 = arith.mulf %169, %173 : vector<4x32xf32>
    %175 = arith.addf %171, %174 : vector<4x32xf32>
    %176 = math.tanh %175 : vector<4x32xf32>
    %cst_59 = arith.constant 1.000000e+00 : f32
    %177 = vector.broadcast %cst_59 : f32 to vector<4x32xf32>
    %178 = arith.subf %177, %170 : vector<4x32xf32>
    %179 = arith.mulf %178, %176 : vector<4x32xf32>
    %180 = arith.mulf %170, %123 : vector<4x32xf32>
    %181 = arith.addf %179, %180 : vector<4x32xf32>
    %c2 = arith.constant 2 : index
    %c0_60 = arith.constant 0 : index
    %c0_61 = arith.constant 0 : index
    %182 = vector.load %arg6[%c2, %c0_60, %c0_61] : memref<8x32x64xf32, #tpu.memory_space<vmem>>, vector<1x32x64xf32>
    %183 = vector.shape_cast %182 : vector<1x32x64xf32> to vector<32x64xf32>
    %cst_62 = arith.constant dense<0.000000e+00> : vector<4x64xf32>
    %184 = tpu.matmul %158, %183, %cst_62 {dimension_numbers = #tpu.dot_dimension_numbers<[1], [0], [0], [1], [0, 0, 1, 1], [], []>} : vector<4x32xf32>, vector<32x64xf32>, vector<4x64xf32> -> vector<4x64xf32>
    %185 = arith.addf %127, %184 : vector<4x64xf32>
    %c2_63 = arith.constant 2 : index
    %c0_64 = arith.constant 0 : index
    %c0_65 = arith.constant 0 : index
    %186 = vector.load %arg7[%c2_63, %c0_64, %c0_65] : memref<8x32x64xf32, #tpu.memory_space<vmem>>, vector<1x32x64xf32>
    %187 = vector.shape_cast %186 : vector<1x32x64xf32> to vector<32x64xf32>
    %cst_66 = arith.constant dense<0.000000e+00> : vector<4x64xf32>
    %188 = tpu.matmul %181, %187, %cst_66 {dimension_numbers = #tpu.dot_dimension_numbers<[1], [0], [0], [1], [0, 0, 1, 1], [], []>} : vector<4x32xf32>, vector<32x64xf32>, vector<4x64xf32> -> vector<4x64xf32>
    %189 = arith.addf %131, %188 : vector<4x64xf32>
    %190 = vector.extract_strided_slice %7 {offsets = [24, 0], sizes = [4, 96], strides = [1, 1]} : vector<64x96xf32> to vector<4x96xf32>
    %191 = vector.extract_strided_slice %7 {offsets = [28, 0], sizes = [4, 96], strides = [1, 1]} : vector<64x96xf32> to vector<4x96xf32>
    %cst_67 = arith.constant dense<0.000000e+00> : vector<4x96xf32>
    %192 = tpu.matmul %158, %8, %cst_67 {dimension_numbers = #tpu.dot_dimension_numbers<[1], [0], [0], [1], [0, 0, 1, 1], [], []>} : vector<4x32xf32>, vector<32x96xf32>, vector<4x96xf32> -> vector<4x96xf32>
    %cst_68 = arith.constant dense<0.000000e+00> : vector<4x96xf32>
    %193 = tpu.matmul %181, %9, %cst_68 {dimension_numbers = #tpu.dot_dimension_numbers<[1], [0], [0], [1], [0, 0, 1, 1], [], []>} : vector<4x32xf32>, vector<32x96xf32>, vector<4x96xf32> -> vector<4x96xf32>
    %194 = vector.extract_strided_slice %190 {offsets = [0, 0], sizes = [4, 64], strides = [1, 1]} : vector<4x96xf32> to vector<4x64xf32>
    %195 = vector.extract_strided_slice %192 {offsets = [0, 0], sizes = [4, 64], strides = [1, 1]} : vector<4x96xf32> to vector<4x64xf32>
    %196 = arith.addf %194, %195 : vector<4x64xf32>
    %cst_69 = arith.constant 5.000000e-01 : f32
    %197 = vector.broadcast %cst_69 : f32 to vector<4x64xf32>
    %198 = arith.mulf %197, %196 : vector<4x64xf32>
    %199 = math.tanh %198 : vector<4x64xf32>
    %cst_70 = arith.constant 1.000000e+00 : f32
    %200 = vector.broadcast %cst_70 : f32 to vector<4x64xf32>
    %201 = arith.addf %199, %200 : vector<4x64xf32>
    %cst_71 = arith.constant 5.000000e-01 : f32
    %202 = vector.broadcast %cst_71 : f32 to vector<4x64xf32>
    %203 = arith.mulf %202, %201 : vector<4x64xf32>
    %204 = vector.extract_strided_slice %203 {offsets = [0, 0], sizes = [4, 32], strides = [1, 1]} : vector<4x64xf32> to vector<4x32xf32>
    %205 = vector.extract_strided_slice %203 {offsets = [0, 32], sizes = [4, 32], strides = [1, 1]} : vector<4x64xf32> to vector<4x32xf32>
    %206 = vector.extract_strided_slice %190 {offsets = [0, 64], sizes = [4, 32], strides = [1, 1]} : vector<4x96xf32> to vector<4x32xf32>
    %207 = vector.extract_strided_slice %192 {offsets = [0, 64], sizes = [4, 32], strides = [1, 1]} : vector<4x96xf32> to vector<4x32xf32>
    %208 = arith.addf %207, %10 : vector<4x32xf32>
    %209 = arith.mulf %204, %208 : vector<4x32xf32>
    %210 = arith.addf %206, %209 : vector<4x32xf32>
    %211 = math.tanh %210 : vector<4x32xf32>
    %cst_72 = arith.constant 1.000000e+00 : f32
    %212 = vector.broadcast %cst_72 : f32 to vector<4x32xf32>
    %213 = arith.subf %212, %205 : vector<4x32xf32>
    %214 = arith.mulf %213, %211 : vector<4x32xf32>
    %215 = arith.mulf %205, %158 : vector<4x32xf32>
    %216 = arith.addf %214, %215 : vector<4x32xf32>
    %217 = vector.extract_strided_slice %191 {offsets = [0, 0], sizes = [4, 64], strides = [1, 1]} : vector<4x96xf32> to vector<4x64xf32>
    %218 = vector.extract_strided_slice %193 {offsets = [0, 0], sizes = [4, 64], strides = [1, 1]} : vector<4x96xf32> to vector<4x64xf32>
    %219 = arith.addf %217, %218 : vector<4x64xf32>
    %cst_73 = arith.constant 5.000000e-01 : f32
    %220 = vector.broadcast %cst_73 : f32 to vector<4x64xf32>
    %221 = arith.mulf %220, %219 : vector<4x64xf32>
    %222 = math.tanh %221 : vector<4x64xf32>
    %cst_74 = arith.constant 1.000000e+00 : f32
    %223 = vector.broadcast %cst_74 : f32 to vector<4x64xf32>
    %224 = arith.addf %222, %223 : vector<4x64xf32>
    %cst_75 = arith.constant 5.000000e-01 : f32
    %225 = vector.broadcast %cst_75 : f32 to vector<4x64xf32>
    %226 = arith.mulf %225, %224 : vector<4x64xf32>
    %227 = vector.extract_strided_slice %226 {offsets = [0, 0], sizes = [4, 32], strides = [1, 1]} : vector<4x64xf32> to vector<4x32xf32>
    %228 = vector.extract_strided_slice %226 {offsets = [0, 32], sizes = [4, 32], strides = [1, 1]} : vector<4x64xf32> to vector<4x32xf32>
    %229 = vector.extract_strided_slice %191 {offsets = [0, 64], sizes = [4, 32], strides = [1, 1]} : vector<4x96xf32> to vector<4x32xf32>
    %230 = vector.extract_strided_slice %193 {offsets = [0, 64], sizes = [4, 32], strides = [1, 1]} : vector<4x96xf32> to vector<4x32xf32>
    %231 = arith.addf %230, %11 : vector<4x32xf32>
    %232 = arith.mulf %227, %231 : vector<4x32xf32>
    %233 = arith.addf %229, %232 : vector<4x32xf32>
    %234 = math.tanh %233 : vector<4x32xf32>
    %cst_76 = arith.constant 1.000000e+00 : f32
    %235 = vector.broadcast %cst_76 : f32 to vector<4x32xf32>
    %236 = arith.subf %235, %228 : vector<4x32xf32>
    %237 = arith.mulf %236, %234 : vector<4x32xf32>
    %238 = arith.mulf %228, %181 : vector<4x32xf32>
    %239 = arith.addf %237, %238 : vector<4x32xf32>
    %c3 = arith.constant 3 : index
    %c0_77 = arith.constant 0 : index
    %c0_78 = arith.constant 0 : index
    %240 = vector.load %arg6[%c3, %c0_77, %c0_78] : memref<8x32x64xf32, #tpu.memory_space<vmem>>, vector<1x32x64xf32>
    %241 = vector.shape_cast %240 : vector<1x32x64xf32> to vector<32x64xf32>
    %cst_79 = arith.constant dense<0.000000e+00> : vector<4x64xf32>
    %242 = tpu.matmul %216, %241, %cst_79 {dimension_numbers = #tpu.dot_dimension_numbers<[1], [0], [0], [1], [0, 0, 1, 1], [], []>} : vector<4x32xf32>, vector<32x64xf32>, vector<4x64xf32> -> vector<4x64xf32>
    %243 = arith.addf %185, %242 : vector<4x64xf32>
    %c3_80 = arith.constant 3 : index
    %c0_81 = arith.constant 0 : index
    %c0_82 = arith.constant 0 : index
    %244 = vector.load %arg7[%c3_80, %c0_81, %c0_82] : memref<8x32x64xf32, #tpu.memory_space<vmem>>, vector<1x32x64xf32>
    %245 = vector.shape_cast %244 : vector<1x32x64xf32> to vector<32x64xf32>
    %cst_83 = arith.constant dense<0.000000e+00> : vector<4x64xf32>
    %246 = tpu.matmul %239, %245, %cst_83 {dimension_numbers = #tpu.dot_dimension_numbers<[1], [0], [0], [1], [0, 0, 1, 1], [], []>} : vector<4x32xf32>, vector<32x64xf32>, vector<4x64xf32> -> vector<4x64xf32>
    %247 = arith.addf %189, %246 : vector<4x64xf32>
    %248 = vector.extract_strided_slice %7 {offsets = [32, 0], sizes = [4, 96], strides = [1, 1]} : vector<64x96xf32> to vector<4x96xf32>
    %249 = vector.extract_strided_slice %7 {offsets = [36, 0], sizes = [4, 96], strides = [1, 1]} : vector<64x96xf32> to vector<4x96xf32>
    %cst_84 = arith.constant dense<0.000000e+00> : vector<4x96xf32>
    %250 = tpu.matmul %216, %8, %cst_84 {dimension_numbers = #tpu.dot_dimension_numbers<[1], [0], [0], [1], [0, 0, 1, 1], [], []>} : vector<4x32xf32>, vector<32x96xf32>, vector<4x96xf32> -> vector<4x96xf32>
    %cst_85 = arith.constant dense<0.000000e+00> : vector<4x96xf32>
    %251 = tpu.matmul %239, %9, %cst_85 {dimension_numbers = #tpu.dot_dimension_numbers<[1], [0], [0], [1], [0, 0, 1, 1], [], []>} : vector<4x32xf32>, vector<32x96xf32>, vector<4x96xf32> -> vector<4x96xf32>
    %252 = vector.extract_strided_slice %248 {offsets = [0, 0], sizes = [4, 64], strides = [1, 1]} : vector<4x96xf32> to vector<4x64xf32>
    %253 = vector.extract_strided_slice %250 {offsets = [0, 0], sizes = [4, 64], strides = [1, 1]} : vector<4x96xf32> to vector<4x64xf32>
    %254 = arith.addf %252, %253 : vector<4x64xf32>
    %cst_86 = arith.constant 5.000000e-01 : f32
    %255 = vector.broadcast %cst_86 : f32 to vector<4x64xf32>
    %256 = arith.mulf %255, %254 : vector<4x64xf32>
    %257 = math.tanh %256 : vector<4x64xf32>
    %cst_87 = arith.constant 1.000000e+00 : f32
    %258 = vector.broadcast %cst_87 : f32 to vector<4x64xf32>
    %259 = arith.addf %257, %258 : vector<4x64xf32>
    %cst_88 = arith.constant 5.000000e-01 : f32
    %260 = vector.broadcast %cst_88 : f32 to vector<4x64xf32>
    %261 = arith.mulf %260, %259 : vector<4x64xf32>
    %262 = vector.extract_strided_slice %261 {offsets = [0, 0], sizes = [4, 32], strides = [1, 1]} : vector<4x64xf32> to vector<4x32xf32>
    %263 = vector.extract_strided_slice %261 {offsets = [0, 32], sizes = [4, 32], strides = [1, 1]} : vector<4x64xf32> to vector<4x32xf32>
    %264 = vector.extract_strided_slice %248 {offsets = [0, 64], sizes = [4, 32], strides = [1, 1]} : vector<4x96xf32> to vector<4x32xf32>
    %265 = vector.extract_strided_slice %250 {offsets = [0, 64], sizes = [4, 32], strides = [1, 1]} : vector<4x96xf32> to vector<4x32xf32>
    %266 = arith.addf %265, %10 : vector<4x32xf32>
    %267 = arith.mulf %262, %266 : vector<4x32xf32>
    %268 = arith.addf %264, %267 : vector<4x32xf32>
    %269 = math.tanh %268 : vector<4x32xf32>
    %cst_89 = arith.constant 1.000000e+00 : f32
    %270 = vector.broadcast %cst_89 : f32 to vector<4x32xf32>
    %271 = arith.subf %270, %263 : vector<4x32xf32>
    %272 = arith.mulf %271, %269 : vector<4x32xf32>
    %273 = arith.mulf %263, %216 : vector<4x32xf32>
    %274 = arith.addf %272, %273 : vector<4x32xf32>
    %275 = vector.extract_strided_slice %249 {offsets = [0, 0], sizes = [4, 64], strides = [1, 1]} : vector<4x96xf32> to vector<4x64xf32>
    %276 = vector.extract_strided_slice %251 {offsets = [0, 0], sizes = [4, 64], strides = [1, 1]} : vector<4x96xf32> to vector<4x64xf32>
    %277 = arith.addf %275, %276 : vector<4x64xf32>
    %cst_90 = arith.constant 5.000000e-01 : f32
    %278 = vector.broadcast %cst_90 : f32 to vector<4x64xf32>
    %279 = arith.mulf %278, %277 : vector<4x64xf32>
    %280 = math.tanh %279 : vector<4x64xf32>
    %cst_91 = arith.constant 1.000000e+00 : f32
    %281 = vector.broadcast %cst_91 : f32 to vector<4x64xf32>
    %282 = arith.addf %280, %281 : vector<4x64xf32>
    %cst_92 = arith.constant 5.000000e-01 : f32
    %283 = vector.broadcast %cst_92 : f32 to vector<4x64xf32>
    %284 = arith.mulf %283, %282 : vector<4x64xf32>
    %285 = vector.extract_strided_slice %284 {offsets = [0, 0], sizes = [4, 32], strides = [1, 1]} : vector<4x64xf32> to vector<4x32xf32>
    %286 = vector.extract_strided_slice %284 {offsets = [0, 32], sizes = [4, 32], strides = [1, 1]} : vector<4x64xf32> to vector<4x32xf32>
    %287 = vector.extract_strided_slice %249 {offsets = [0, 64], sizes = [4, 32], strides = [1, 1]} : vector<4x96xf32> to vector<4x32xf32>
    %288 = vector.extract_strided_slice %251 {offsets = [0, 64], sizes = [4, 32], strides = [1, 1]} : vector<4x96xf32> to vector<4x32xf32>
    %289 = arith.addf %288, %11 : vector<4x32xf32>
    %290 = arith.mulf %285, %289 : vector<4x32xf32>
    %291 = arith.addf %287, %290 : vector<4x32xf32>
    %292 = math.tanh %291 : vector<4x32xf32>
    %cst_93 = arith.constant 1.000000e+00 : f32
    %293 = vector.broadcast %cst_93 : f32 to vector<4x32xf32>
    %294 = arith.subf %293, %286 : vector<4x32xf32>
    %295 = arith.mulf %294, %292 : vector<4x32xf32>
    %296 = arith.mulf %286, %239 : vector<4x32xf32>
    %297 = arith.addf %295, %296 : vector<4x32xf32>
    %c4 = arith.constant 4 : index
    %c0_94 = arith.constant 0 : index
    %c0_95 = arith.constant 0 : index
    %298 = vector.load %arg6[%c4, %c0_94, %c0_95] : memref<8x32x64xf32, #tpu.memory_space<vmem>>, vector<1x32x64xf32>
    %299 = vector.shape_cast %298 : vector<1x32x64xf32> to vector<32x64xf32>
    %cst_96 = arith.constant dense<0.000000e+00> : vector<4x64xf32>
    %300 = tpu.matmul %274, %299, %cst_96 {dimension_numbers = #tpu.dot_dimension_numbers<[1], [0], [0], [1], [0, 0, 1, 1], [], []>} : vector<4x32xf32>, vector<32x64xf32>, vector<4x64xf32> -> vector<4x64xf32>
    %301 = arith.addf %243, %300 : vector<4x64xf32>
    %c4_97 = arith.constant 4 : index
    %c0_98 = arith.constant 0 : index
    %c0_99 = arith.constant 0 : index
    %302 = vector.load %arg7[%c4_97, %c0_98, %c0_99] : memref<8x32x64xf32, #tpu.memory_space<vmem>>, vector<1x32x64xf32>
    %303 = vector.shape_cast %302 : vector<1x32x64xf32> to vector<32x64xf32>
    %cst_100 = arith.constant dense<0.000000e+00> : vector<4x64xf32>
    %304 = tpu.matmul %297, %303, %cst_100 {dimension_numbers = #tpu.dot_dimension_numbers<[1], [0], [0], [1], [0, 0, 1, 1], [], []>} : vector<4x32xf32>, vector<32x64xf32>, vector<4x64xf32> -> vector<4x64xf32>
    %305 = arith.addf %247, %304 : vector<4x64xf32>
    %306 = vector.extract_strided_slice %7 {offsets = [40, 0], sizes = [4, 96], strides = [1, 1]} : vector<64x96xf32> to vector<4x96xf32>
    %307 = vector.extract_strided_slice %7 {offsets = [44, 0], sizes = [4, 96], strides = [1, 1]} : vector<64x96xf32> to vector<4x96xf32>
    %cst_101 = arith.constant dense<0.000000e+00> : vector<4x96xf32>
    %308 = tpu.matmul %274, %8, %cst_101 {dimension_numbers = #tpu.dot_dimension_numbers<[1], [0], [0], [1], [0, 0, 1, 1], [], []>} : vector<4x32xf32>, vector<32x96xf32>, vector<4x96xf32> -> vector<4x96xf32>
    %cst_102 = arith.constant dense<0.000000e+00> : vector<4x96xf32>
    %309 = tpu.matmul %297, %9, %cst_102 {dimension_numbers = #tpu.dot_dimension_numbers<[1], [0], [0], [1], [0, 0, 1, 1], [], []>} : vector<4x32xf32>, vector<32x96xf32>, vector<4x96xf32> -> vector<4x96xf32>
    %310 = vector.extract_strided_slice %306 {offsets = [0, 0], sizes = [4, 64], strides = [1, 1]} : vector<4x96xf32> to vector<4x64xf32>
    %311 = vector.extract_strided_slice %308 {offsets = [0, 0], sizes = [4, 64], strides = [1, 1]} : vector<4x96xf32> to vector<4x64xf32>
    %312 = arith.addf %310, %311 : vector<4x64xf32>
    %cst_103 = arith.constant 5.000000e-01 : f32
    %313 = vector.broadcast %cst_103 : f32 to vector<4x64xf32>
    %314 = arith.mulf %313, %312 : vector<4x64xf32>
    %315 = math.tanh %314 : vector<4x64xf32>
    %cst_104 = arith.constant 1.000000e+00 : f32
    %316 = vector.broadcast %cst_104 : f32 to vector<4x64xf32>
    %317 = arith.addf %315, %316 : vector<4x64xf32>
    %cst_105 = arith.constant 5.000000e-01 : f32
    %318 = vector.broadcast %cst_105 : f32 to vector<4x64xf32>
    %319 = arith.mulf %318, %317 : vector<4x64xf32>
    %320 = vector.extract_strided_slice %319 {offsets = [0, 0], sizes = [4, 32], strides = [1, 1]} : vector<4x64xf32> to vector<4x32xf32>
    %321 = vector.extract_strided_slice %319 {offsets = [0, 32], sizes = [4, 32], strides = [1, 1]} : vector<4x64xf32> to vector<4x32xf32>
    %322 = vector.extract_strided_slice %306 {offsets = [0, 64], sizes = [4, 32], strides = [1, 1]} : vector<4x96xf32> to vector<4x32xf32>
    %323 = vector.extract_strided_slice %308 {offsets = [0, 64], sizes = [4, 32], strides = [1, 1]} : vector<4x96xf32> to vector<4x32xf32>
    %324 = arith.addf %323, %10 : vector<4x32xf32>
    %325 = arith.mulf %320, %324 : vector<4x32xf32>
    %326 = arith.addf %322, %325 : vector<4x32xf32>
    %327 = math.tanh %326 : vector<4x32xf32>
    %cst_106 = arith.constant 1.000000e+00 : f32
    %328 = vector.broadcast %cst_106 : f32 to vector<4x32xf32>
    %329 = arith.subf %328, %321 : vector<4x32xf32>
    %330 = arith.mulf %329, %327 : vector<4x32xf32>
    %331 = arith.mulf %321, %274 : vector<4x32xf32>
    %332 = arith.addf %330, %331 : vector<4x32xf32>
    %333 = vector.extract_strided_slice %307 {offsets = [0, 0], sizes = [4, 64], strides = [1, 1]} : vector<4x96xf32> to vector<4x64xf32>
    %334 = vector.extract_strided_slice %309 {offsets = [0, 0], sizes = [4, 64], strides = [1, 1]} : vector<4x96xf32> to vector<4x64xf32>
    %335 = arith.addf %333, %334 : vector<4x64xf32>
    %cst_107 = arith.constant 5.000000e-01 : f32
    %336 = vector.broadcast %cst_107 : f32 to vector<4x64xf32>
    %337 = arith.mulf %336, %335 : vector<4x64xf32>
    %338 = math.tanh %337 : vector<4x64xf32>
    %cst_108 = arith.constant 1.000000e+00 : f32
    %339 = vector.broadcast %cst_108 : f32 to vector<4x64xf32>
    %340 = arith.addf %338, %339 : vector<4x64xf32>
    %cst_109 = arith.constant 5.000000e-01 : f32
    %341 = vector.broadcast %cst_109 : f32 to vector<4x64xf32>
    %342 = arith.mulf %341, %340 : vector<4x64xf32>
    %343 = vector.extract_strided_slice %342 {offsets = [0, 0], sizes = [4, 32], strides = [1, 1]} : vector<4x64xf32> to vector<4x32xf32>
    %344 = vector.extract_strided_slice %342 {offsets = [0, 32], sizes = [4, 32], strides = [1, 1]} : vector<4x64xf32> to vector<4x32xf32>
    %345 = vector.extract_strided_slice %307 {offsets = [0, 64], sizes = [4, 32], strides = [1, 1]} : vector<4x96xf32> to vector<4x32xf32>
    %346 = vector.extract_strided_slice %309 {offsets = [0, 64], sizes = [4, 32], strides = [1, 1]} : vector<4x96xf32> to vector<4x32xf32>
    %347 = arith.addf %346, %11 : vector<4x32xf32>
    %348 = arith.mulf %343, %347 : vector<4x32xf32>
    %349 = arith.addf %345, %348 : vector<4x32xf32>
    %350 = math.tanh %349 : vector<4x32xf32>
    %cst_110 = arith.constant 1.000000e+00 : f32
    %351 = vector.broadcast %cst_110 : f32 to vector<4x32xf32>
    %352 = arith.subf %351, %344 : vector<4x32xf32>
    %353 = arith.mulf %352, %350 : vector<4x32xf32>
    %354 = arith.mulf %344, %297 : vector<4x32xf32>
    %355 = arith.addf %353, %354 : vector<4x32xf32>
    %c5 = arith.constant 5 : index
    %c0_111 = arith.constant 0 : index
    %c0_112 = arith.constant 0 : index
    %356 = vector.load %arg6[%c5, %c0_111, %c0_112] : memref<8x32x64xf32, #tpu.memory_space<vmem>>, vector<1x32x64xf32>
    %357 = vector.shape_cast %356 : vector<1x32x64xf32> to vector<32x64xf32>
    %cst_113 = arith.constant dense<0.000000e+00> : vector<4x64xf32>
    %358 = tpu.matmul %332, %357, %cst_113 {dimension_numbers = #tpu.dot_dimension_numbers<[1], [0], [0], [1], [0, 0, 1, 1], [], []>} : vector<4x32xf32>, vector<32x64xf32>, vector<4x64xf32> -> vector<4x64xf32>
    %359 = arith.addf %301, %358 : vector<4x64xf32>
    %c5_114 = arith.constant 5 : index
    %c0_115 = arith.constant 0 : index
    %c0_116 = arith.constant 0 : index
    %360 = vector.load %arg7[%c5_114, %c0_115, %c0_116] : memref<8x32x64xf32, #tpu.memory_space<vmem>>, vector<1x32x64xf32>
    %361 = vector.shape_cast %360 : vector<1x32x64xf32> to vector<32x64xf32>
    %cst_117 = arith.constant dense<0.000000e+00> : vector<4x64xf32>
    %362 = tpu.matmul %355, %361, %cst_117 {dimension_numbers = #tpu.dot_dimension_numbers<[1], [0], [0], [1], [0, 0, 1, 1], [], []>} : vector<4x32xf32>, vector<32x64xf32>, vector<4x64xf32> -> vector<4x64xf32>
    %363 = arith.addf %305, %362 : vector<4x64xf32>
    %364 = vector.extract_strided_slice %7 {offsets = [48, 0], sizes = [4, 96], strides = [1, 1]} : vector<64x96xf32> to vector<4x96xf32>
    %365 = vector.extract_strided_slice %7 {offsets = [52, 0], sizes = [4, 96], strides = [1, 1]} : vector<64x96xf32> to vector<4x96xf32>
    %cst_118 = arith.constant dense<0.000000e+00> : vector<4x96xf32>
    %366 = tpu.matmul %332, %8, %cst_118 {dimension_numbers = #tpu.dot_dimension_numbers<[1], [0], [0], [1], [0, 0, 1, 1], [], []>} : vector<4x32xf32>, vector<32x96xf32>, vector<4x96xf32> -> vector<4x96xf32>
    %cst_119 = arith.constant dense<0.000000e+00> : vector<4x96xf32>
    %367 = tpu.matmul %355, %9, %cst_119 {dimension_numbers = #tpu.dot_dimension_numbers<[1], [0], [0], [1], [0, 0, 1, 1], [], []>} : vector<4x32xf32>, vector<32x96xf32>, vector<4x96xf32> -> vector<4x96xf32>
    %368 = vector.extract_strided_slice %364 {offsets = [0, 0], sizes = [4, 64], strides = [1, 1]} : vector<4x96xf32> to vector<4x64xf32>
    %369 = vector.extract_strided_slice %366 {offsets = [0, 0], sizes = [4, 64], strides = [1, 1]} : vector<4x96xf32> to vector<4x64xf32>
    %370 = arith.addf %368, %369 : vector<4x64xf32>
    %cst_120 = arith.constant 5.000000e-01 : f32
    %371 = vector.broadcast %cst_120 : f32 to vector<4x64xf32>
    %372 = arith.mulf %371, %370 : vector<4x64xf32>
    %373 = math.tanh %372 : vector<4x64xf32>
    %cst_121 = arith.constant 1.000000e+00 : f32
    %374 = vector.broadcast %cst_121 : f32 to vector<4x64xf32>
    %375 = arith.addf %373, %374 : vector<4x64xf32>
    %cst_122 = arith.constant 5.000000e-01 : f32
    %376 = vector.broadcast %cst_122 : f32 to vector<4x64xf32>
    %377 = arith.mulf %376, %375 : vector<4x64xf32>
    %378 = vector.extract_strided_slice %377 {offsets = [0, 0], sizes = [4, 32], strides = [1, 1]} : vector<4x64xf32> to vector<4x32xf32>
    %379 = vector.extract_strided_slice %377 {offsets = [0, 32], sizes = [4, 32], strides = [1, 1]} : vector<4x64xf32> to vector<4x32xf32>
    %380 = vector.extract_strided_slice %364 {offsets = [0, 64], sizes = [4, 32], strides = [1, 1]} : vector<4x96xf32> to vector<4x32xf32>
    %381 = vector.extract_strided_slice %366 {offsets = [0, 64], sizes = [4, 32], strides = [1, 1]} : vector<4x96xf32> to vector<4x32xf32>
    %382 = arith.addf %381, %10 : vector<4x32xf32>
    %383 = arith.mulf %378, %382 : vector<4x32xf32>
    %384 = arith.addf %380, %383 : vector<4x32xf32>
    %385 = math.tanh %384 : vector<4x32xf32>
    %cst_123 = arith.constant 1.000000e+00 : f32
    %386 = vector.broadcast %cst_123 : f32 to vector<4x32xf32>
    %387 = arith.subf %386, %379 : vector<4x32xf32>
    %388 = arith.mulf %387, %385 : vector<4x32xf32>
    %389 = arith.mulf %379, %332 : vector<4x32xf32>
    %390 = arith.addf %388, %389 : vector<4x32xf32>
    %391 = vector.extract_strided_slice %365 {offsets = [0, 0], sizes = [4, 64], strides = [1, 1]} : vector<4x96xf32> to vector<4x64xf32>
    %392 = vector.extract_strided_slice %367 {offsets = [0, 0], sizes = [4, 64], strides = [1, 1]} : vector<4x96xf32> to vector<4x64xf32>
    %393 = arith.addf %391, %392 : vector<4x64xf32>
    %cst_124 = arith.constant 5.000000e-01 : f32
    %394 = vector.broadcast %cst_124 : f32 to vector<4x64xf32>
    %395 = arith.mulf %394, %393 : vector<4x64xf32>
    %396 = math.tanh %395 : vector<4x64xf32>
    %cst_125 = arith.constant 1.000000e+00 : f32
    %397 = vector.broadcast %cst_125 : f32 to vector<4x64xf32>
    %398 = arith.addf %396, %397 : vector<4x64xf32>
    %cst_126 = arith.constant 5.000000e-01 : f32
    %399 = vector.broadcast %cst_126 : f32 to vector<4x64xf32>
    %400 = arith.mulf %399, %398 : vector<4x64xf32>
    %401 = vector.extract_strided_slice %400 {offsets = [0, 0], sizes = [4, 32], strides = [1, 1]} : vector<4x64xf32> to vector<4x32xf32>
    %402 = vector.extract_strided_slice %400 {offsets = [0, 32], sizes = [4, 32], strides = [1, 1]} : vector<4x64xf32> to vector<4x32xf32>
    %403 = vector.extract_strided_slice %365 {offsets = [0, 64], sizes = [4, 32], strides = [1, 1]} : vector<4x96xf32> to vector<4x32xf32>
    %404 = vector.extract_strided_slice %367 {offsets = [0, 64], sizes = [4, 32], strides = [1, 1]} : vector<4x96xf32> to vector<4x32xf32>
    %405 = arith.addf %404, %11 : vector<4x32xf32>
    %406 = arith.mulf %401, %405 : vector<4x32xf32>
    %407 = arith.addf %403, %406 : vector<4x32xf32>
    %408 = math.tanh %407 : vector<4x32xf32>
    %cst_127 = arith.constant 1.000000e+00 : f32
    %409 = vector.broadcast %cst_127 : f32 to vector<4x32xf32>
    %410 = arith.subf %409, %402 : vector<4x32xf32>
    %411 = arith.mulf %410, %408 : vector<4x32xf32>
    %412 = arith.mulf %402, %355 : vector<4x32xf32>
    %413 = arith.addf %411, %412 : vector<4x32xf32>
    %c6 = arith.constant 6 : index
    %c0_128 = arith.constant 0 : index
    %c0_129 = arith.constant 0 : index
    %414 = vector.load %arg6[%c6, %c0_128, %c0_129] : memref<8x32x64xf32, #tpu.memory_space<vmem>>, vector<1x32x64xf32>
    %415 = vector.shape_cast %414 : vector<1x32x64xf32> to vector<32x64xf32>
    %cst_130 = arith.constant dense<0.000000e+00> : vector<4x64xf32>
    %416 = tpu.matmul %390, %415, %cst_130 {dimension_numbers = #tpu.dot_dimension_numbers<[1], [0], [0], [1], [0, 0, 1, 1], [], []>} : vector<4x32xf32>, vector<32x64xf32>, vector<4x64xf32> -> vector<4x64xf32>
    %417 = arith.addf %359, %416 : vector<4x64xf32>
    %c6_131 = arith.constant 6 : index
    %c0_132 = arith.constant 0 : index
    %c0_133 = arith.constant 0 : index
    %418 = vector.load %arg7[%c6_131, %c0_132, %c0_133] : memref<8x32x64xf32, #tpu.memory_space<vmem>>, vector<1x32x64xf32>
    %419 = vector.shape_cast %418 : vector<1x32x64xf32> to vector<32x64xf32>
    %cst_134 = arith.constant dense<0.000000e+00> : vector<4x64xf32>
    %420 = tpu.matmul %413, %419, %cst_134 {dimension_numbers = #tpu.dot_dimension_numbers<[1], [0], [0], [1], [0, 0, 1, 1], [], []>} : vector<4x32xf32>, vector<32x64xf32>, vector<4x64xf32> -> vector<4x64xf32>
    %421 = arith.addf %363, %420 : vector<4x64xf32>
    %422 = vector.extract_strided_slice %7 {offsets = [56, 0], sizes = [4, 96], strides = [1, 1]} : vector<64x96xf32> to vector<4x96xf32>
    %423 = vector.extract_strided_slice %7 {offsets = [60, 0], sizes = [4, 96], strides = [1, 1]} : vector<64x96xf32> to vector<4x96xf32>
    %cst_135 = arith.constant dense<0.000000e+00> : vector<4x96xf32>
    %424 = tpu.matmul %390, %8, %cst_135 {dimension_numbers = #tpu.dot_dimension_numbers<[1], [0], [0], [1], [0, 0, 1, 1], [], []>} : vector<4x32xf32>, vector<32x96xf32>, vector<4x96xf32> -> vector<4x96xf32>
    %cst_136 = arith.constant dense<0.000000e+00> : vector<4x96xf32>
    %425 = tpu.matmul %413, %9, %cst_136 {dimension_numbers = #tpu.dot_dimension_numbers<[1], [0], [0], [1], [0, 0, 1, 1], [], []>} : vector<4x32xf32>, vector<32x96xf32>, vector<4x96xf32> -> vector<4x96xf32>
    %426 = vector.extract_strided_slice %422 {offsets = [0, 0], sizes = [4, 64], strides = [1, 1]} : vector<4x96xf32> to vector<4x64xf32>
    %427 = vector.extract_strided_slice %424 {offsets = [0, 0], sizes = [4, 64], strides = [1, 1]} : vector<4x96xf32> to vector<4x64xf32>
    %428 = arith.addf %426, %427 : vector<4x64xf32>
    %cst_137 = arith.constant 5.000000e-01 : f32
    %429 = vector.broadcast %cst_137 : f32 to vector<4x64xf32>
    %430 = arith.mulf %429, %428 : vector<4x64xf32>
    %431 = math.tanh %430 : vector<4x64xf32>
    %cst_138 = arith.constant 1.000000e+00 : f32
    %432 = vector.broadcast %cst_138 : f32 to vector<4x64xf32>
    %433 = arith.addf %431, %432 : vector<4x64xf32>
    %cst_139 = arith.constant 5.000000e-01 : f32
    %434 = vector.broadcast %cst_139 : f32 to vector<4x64xf32>
    %435 = arith.mulf %434, %433 : vector<4x64xf32>
    %436 = vector.extract_strided_slice %435 {offsets = [0, 0], sizes = [4, 32], strides = [1, 1]} : vector<4x64xf32> to vector<4x32xf32>
    %437 = vector.extract_strided_slice %435 {offsets = [0, 32], sizes = [4, 32], strides = [1, 1]} : vector<4x64xf32> to vector<4x32xf32>
    %438 = vector.extract_strided_slice %422 {offsets = [0, 64], sizes = [4, 32], strides = [1, 1]} : vector<4x96xf32> to vector<4x32xf32>
    %439 = vector.extract_strided_slice %424 {offsets = [0, 64], sizes = [4, 32], strides = [1, 1]} : vector<4x96xf32> to vector<4x32xf32>
    %440 = arith.addf %439, %10 : vector<4x32xf32>
    %441 = arith.mulf %436, %440 : vector<4x32xf32>
    %442 = arith.addf %438, %441 : vector<4x32xf32>
    %443 = math.tanh %442 : vector<4x32xf32>
    %cst_140 = arith.constant 1.000000e+00 : f32
    %444 = vector.broadcast %cst_140 : f32 to vector<4x32xf32>
    %445 = arith.subf %444, %437 : vector<4x32xf32>
    %446 = arith.mulf %445, %443 : vector<4x32xf32>
    %447 = arith.mulf %437, %390 : vector<4x32xf32>
    %448 = arith.addf %446, %447 : vector<4x32xf32>
    %449 = vector.extract_strided_slice %423 {offsets = [0, 0], sizes = [4, 64], strides = [1, 1]} : vector<4x96xf32> to vector<4x64xf32>
    %450 = vector.extract_strided_slice %425 {offsets = [0, 0], sizes = [4, 64], strides = [1, 1]} : vector<4x96xf32> to vector<4x64xf32>
    %451 = arith.addf %449, %450 : vector<4x64xf32>
    %cst_141 = arith.constant 5.000000e-01 : f32
    %452 = vector.broadcast %cst_141 : f32 to vector<4x64xf32>
    %453 = arith.mulf %452, %451 : vector<4x64xf32>
    %454 = math.tanh %453 : vector<4x64xf32>
    %cst_142 = arith.constant 1.000000e+00 : f32
    %455 = vector.broadcast %cst_142 : f32 to vector<4x64xf32>
    %456 = arith.addf %454, %455 : vector<4x64xf32>
    %cst_143 = arith.constant 5.000000e-01 : f32
    %457 = vector.broadcast %cst_143 : f32 to vector<4x64xf32>
    %458 = arith.mulf %457, %456 : vector<4x64xf32>
    %459 = vector.extract_strided_slice %458 {offsets = [0, 0], sizes = [4, 32], strides = [1, 1]} : vector<4x64xf32> to vector<4x32xf32>
    %460 = vector.extract_strided_slice %458 {offsets = [0, 32], sizes = [4, 32], strides = [1, 1]} : vector<4x64xf32> to vector<4x32xf32>
    %461 = vector.extract_strided_slice %423 {offsets = [0, 64], sizes = [4, 32], strides = [1, 1]} : vector<4x96xf32> to vector<4x32xf32>
    %462 = vector.extract_strided_slice %425 {offsets = [0, 64], sizes = [4, 32], strides = [1, 1]} : vector<4x96xf32> to vector<4x32xf32>
    %463 = arith.addf %462, %11 : vector<4x32xf32>
    %464 = arith.mulf %459, %463 : vector<4x32xf32>
    %465 = arith.addf %461, %464 : vector<4x32xf32>
    %466 = math.tanh %465 : vector<4x32xf32>
    %cst_144 = arith.constant 1.000000e+00 : f32
    %467 = vector.broadcast %cst_144 : f32 to vector<4x32xf32>
    %468 = arith.subf %467, %460 : vector<4x32xf32>
    %469 = arith.mulf %468, %466 : vector<4x32xf32>
    %470 = arith.mulf %460, %413 : vector<4x32xf32>
    %471 = arith.addf %469, %470 : vector<4x32xf32>
    %c7 = arith.constant 7 : index
    %c0_145 = arith.constant 0 : index
    %c0_146 = arith.constant 0 : index
    %472 = vector.load %arg6[%c7, %c0_145, %c0_146] : memref<8x32x64xf32, #tpu.memory_space<vmem>>, vector<1x32x64xf32>
    %473 = vector.shape_cast %472 : vector<1x32x64xf32> to vector<32x64xf32>
    %cst_147 = arith.constant dense<0.000000e+00> : vector<4x64xf32>
    %474 = tpu.matmul %448, %473, %cst_147 {dimension_numbers = #tpu.dot_dimension_numbers<[1], [0], [0], [1], [0, 0, 1, 1], [], []>} : vector<4x32xf32>, vector<32x64xf32>, vector<4x64xf32> -> vector<4x64xf32>
    %475 = arith.addf %417, %474 : vector<4x64xf32>
    %c7_148 = arith.constant 7 : index
    %c0_149 = arith.constant 0 : index
    %c0_150 = arith.constant 0 : index
    %476 = vector.load %arg7[%c7_148, %c0_149, %c0_150] : memref<8x32x64xf32, #tpu.memory_space<vmem>>, vector<1x32x64xf32>
    %477 = vector.shape_cast %476 : vector<1x32x64xf32> to vector<32x64xf32>
    %cst_151 = arith.constant dense<0.000000e+00> : vector<4x64xf32>
    %478 = tpu.matmul %471, %477, %cst_151 {dimension_numbers = #tpu.dot_dimension_numbers<[1], [0], [0], [1], [0, 0, 1, 1], [], []>} : vector<4x32xf32>, vector<32x64xf32>, vector<4x64xf32> -> vector<4x64xf32>
    %479 = arith.addf %421, %478 : vector<4x64xf32>
    %480 = arith.addf %475, %479 : vector<4x64xf32>
    %c0_152 = arith.constant 0 : index
    %c0_153 = arith.constant 0 : index
    %481 = vector.load %arg8[%c0_152, %c0_153] : memref<4x64xf32, #tpu.memory_space<vmem>>, vector<4x64xf32>
    %482 = arith.addf %480, %481 : vector<4x64xf32>
    %c0_154 = arith.constant 0 : index
    %c0_155 = arith.constant 0 : index
    %483 = vector.load %arg9[%c0_154, %c0_155] : memref<4x64xf32, #tpu.memory_space<vmem>>, vector<4x64xf32>
    tpu.vector_store %arg9[%c0_154, %c0_155], %482 {strides = array<i32>} : memref<4x64xf32, #tpu.memory_space<vmem>>, vector<4x64xf32>,
    return
  }
}

</mosaic_0001>

<bundles_post_ra>
// kernel: forward.1
= control target key start
LH: loop header
LB: loop body
LE: loop exit
PB: predicated region body
PF: predicated region fallthrough
CT: control target
= control target key end

     0   :  { %14 = vsyncpa [#allocation3], 0  ;;  %s4656_s0 = inlined_call_operand.vmem [shape: s32[64,1], index: 0, kind: input, shape index: {}]   ;;  %s4657_s1 = inlined_call_operand.vmem [shape: f32[32,96], index: 1, kind: input, shape index: {}]   ;;  %s4658_s2 = inlined_call_operand.vmem [shape: f32[32,96], index: 2, kind: input, shape index: {}]   ;;  %s4659_s3 = inlined_call_operand.vmem [shape: f32[32,96], index: 3, kind: input, shape index: {}]   ;;  %s4660_s4 = inlined_call_operand.vmem [shape: f32[4,32], index: 4, kind: input, shape index: {}]   ;;  %s4661_s5 = inlined_call_operand.vmem [shape: f32[4,32], index: 5, kind: input, shape index: {}]   ;;  %s4662_s6 = inlined_call_operand.hbm [shape: f32[8,32,64], index: 6, kind: input, shape index: {}]   ;;  %s4663_s7 = inlined_call_operand.hbm [shape: f32[8,32,64], index: 7, kind: input, shape index: {}]   ;;  %s4664_s8 = inlined_call_operand.vmem [shape: f32[4,64], index: 8, kind: input, shape index: {}]   ;;  %s4665_s9 = inlined_call_operand.vmem [shape: f32[4,64], index: 9, kind: output, shape index: {}]  }
   0x1   :  { %15 = vsyncpa [#allocation5], 0  ;;  %s4048_s30 = smov [#allocation2]   ;;  %s4000_s13 = scalar_lea.hbm %s4662_s6, 4096 }
   0x2   :  { %s33_s10 = sshll.u32 %s4048_s30, 4  ;;  %p4001_p0 = scmp.ne.s32.totalorder %s4662_s6, %s4000_s13  ;;  %s34_s10 = int_to_ptr.vmem [resolvable:$true] %s33_s10 }
   0x3   :  { %p4004_p1 = scmp.lt.u32.totalorder %s4000_s13, %s4662_s6 }
   0x5   :  { %p4006_p2 = pnand %p4004_p1, %p4001_p0 }
   0x7   :  { %4009 = shalt.err (!%p4006_p2)
}
   0x8   :  { %s4010_s18 = scalar_lea.vmem %s34_s10, 4096  ;;  %p4015_p4 = scmp.lt.s32.totalorder %s34_s10, %s34_s10 }
   0x9   :  { %p4011_p3 = scmp.ne.s32.totalorder %s34_s10, %s4010_s18  ;;  %p4016_p5 = scmp.lt.s32.totalorder %s4010_s18, %s4010_s18 }
   0xb   :  { %p4017_p6 = por %p4016_p5, %p4015_p4 }
   0xd   :  { %p4018_p7 = pnand %p4017_p6, %p4011_p3 }
   0xf   :  { %4021 = shalt.err (!%p4018_p7)
}
  0x10   :  { %s4049_s19 = smov 128   ;;  %s4050_s20 = smov 8  }
  0x11   :  { %39 = dma.hbm_to_vmem [thread:$0]  %s4662_s6, 4096, %s34_s10, [#allocation3], %s4049_s19, %s4049_s19, %s4050_s20  }
  0x12   :  { %s4051_s23 = smov [#allocation4]   ;;  %s4022_s27 = scalar_lea.hbm %s4663_s7, 4096 }
  0x13   :  { %s45_s24 = sshll.u32 %s4051_s23, 4  ;;  %p4023_p8 = scmp.ne.s32.totalorder %s4663_s7, %s4022_s27  ;;  %s46_s24 = int_to_ptr.vmem [resolvable:$true] %s45_s24 }
  0x14   :  { %p4026_p9 = scmp.lt.u32.totalorder %s4022_s27, %s4663_s7 }
  0x16   :  { %p4028_p10 = pnand %p4026_p9, %p4023_p8 }
  0x18   :  { %4031 = shalt.err (!%p4028_p10)
}
  0x19   :  { %s4032_s12 = scalar_lea.vmem %s46_s24, 4096  ;;  %p4037_p12 = scmp.lt.s32.totalorder %s46_s24, %s46_s24 }
  0x1a   :  { %p4033_p11 = scmp.ne.s32.totalorder %s46_s24, %s4032_s12  ;;  %p4038_p13 = scmp.lt.s32.totalorder %s4032_s12, %s4032_s12 }
  0x1c   :  { %p4039_p0 = por %p4038_p13, %p4037_p12 }
  0x1e   :  { %p4040_p1 = pnand %p4039_p0, %p4033_p11 }
  0x20   :  { %4043 = shalt.err (!%p4040_p1)
}
  0x21   :  { %51 = dma.hbm_to_vmem [thread:$0]  %s4663_s7, 4096, %s46_s24, [#allocation5], %s4049_s19, %s4049_s19, %s4050_s20  }
  0x22   :  { %4044 = dma.done.wait [#allocation3], 4096  }
  0x23   :  { %4045 = vsyncadd [#allocation3], 4294963200 }
  0x24   :  { %4046 = dma.done.wait [#allocation5], 4096  }
  0x25   :  { %4047 = vsyncadd [#allocation5], 4294963200  ;;  %v4052_v0 = vmov 0   ;;  %v4053_v1 = vmov 0.0|0.0   ;;  %vm4054_vm0 = vmmov 0   ;;  %v4055_v2 = vmov 0.0  }
  0x26   :  { %3934 = vset.pattern.permute.xlu0 %v4052_v0  ;;  %3732 = vmatprep.subr.bf16.mxu1 %v4053_v1  ;;  %v60_v3 = vld [vmem:[%s4656_s0] sm:$0xff]  ;;  %v253_v5 = vld [vmem:[%s4658_s2 + $0x8] sm:$0xff]  ;;  %v254_v6 = vld [vmem:[%s4658_s2 + $0x10] sm:$0xff]  ;;  %s4056_s28 = smov 64   ;;  %v68_v25 = vlaneseq  ;;  %vm122_vm1 = vcmask 261120   ;;  %vm3126_vm10 = vcmask 519168  }
  0x27   :  { %3380 = vmatprep.mubr.msk.f32.mxu1 %vm4054_vm0, %v4055_v2  ;;  %3935 = vset.pattern.permute.xlu1 %v4052_v0  ;;  %v252_v4 = vld [vmem:[%s4658_s2] sm:$0xff]  ;;  %v255_v7 = vld [vmem:[%s4658_s2 + $0x18] sm:$0xff]  ;;  %v61_v8 = vld [vmem:[%s4656_s0 + $0x8] sm:$0xff] }
  0x28   :  { %71 = vperm.xlu0 %3934, %v60_v3   ;;  %v4153_v9 = vpack.c.bf16 %v253_v5, %v252_v4  ;;  %v256_v10 = vld [vmem:[%s4659_s3] sm:$0xff]  ;;  %v4162_v12 = vpack.c.bf16 %v255_v7, %v254_v6  ;;  %v119_v14 = vld [vmem:[%s4657_s1 + $0x8] sm:$0xff]  ;;  %v120_v15 = vld [vmem:[%s4657_s1 + $0x10] sm:$0xff]  ;;  %v4212_v26 = vand.u32 127, %v68_v25 }
  0x29   :  { %v261_v11 = vld [vmem:[%s4661_s5] sm:$0xf]  ;;  %v257_v16 = vld [vmem:[%s4659_s3 + $0x8] sm:$0xff]  ;;  %v121_v19 = vld [vmem:[%s4657_s1 + $0x18] sm:$0xff] }
  0x2a   :  { %3734 = vmatpush3.bf16.msra.mxu1 %v4153_v9  ;;  %443 = vrot.lane.b32.xlu1 %v261_v11, %s4056_s28  ;;  %v118_v13 = vld [vmem:[%s4657_s1] sm:$0xff]  ;;  %v3728_v20 = vpack.c.bf16 %v121_v19, %v120_v15  ;;  %v4185_v21 = vpack.c.bf16 %v257_v16, %v256_v10  ;;  %v258_v22 = vld [vmem:[%s4659_s3 + $0x10] sm:$0xff]  ;;  %v259_v23 = vld [vmem:[%s4659_s3 + $0x18] sm:$0xff]  ;;  %s4057_s1 = smov 96  }
  0x2b   :  { %3735 = vmatprep.subr.bf16.mxu1 %v4053_v1  ;;  %v260_v17 = vld [vmem:[%s4660_s4] sm:$0xf]  ;;  %v3724_v18 = vpack.c.bf16 %v119_v14, %v118_v13  ;;  %v4197_v24 = vpack.c.bf16 %v259_v23, %v258_v22  ;;  %v63_v63 = vld [vmem:[%s4656_s0 + $0x18] sm:$0xff]  ;;  %v62_v0 = vld [vmem:[%s4656_s0 + $0x10] sm:$0xff] }
  0x2c   :  { %74 = vperm.xlu0 %3934, %v61_v8   ;;  %v65_v3 = vld [vmem:[%s4656_s0 + $0x28] sm:$0xff]  ;;  %v64_v4 = vld [vmem:[%s4656_s0 + $0x20] sm:$0xff]  ;;  %v67_v5 = vld [vmem:[%s4656_s0 + $0x38] sm:$0xff] }
  0x2d   :  { %3725 = vmatprep.subr.bf16.mxu0 %v3724_v18  ;;  %v66_v6 = vld [vmem:[%s4656_s0 + $0x30] sm:$0xff] }
  0x2e   :  { %3737 = vmatpush3.bf16.msra.mxu1 %v4162_v12  ;;  %411 = vrot.lane.b32.xlu1 %v260_v17, %s4056_s28 }
  0x2f   :  { %3738 = vmatprep.subr.bf16.mxu1 %v4053_v1  ;;  %3727 = vmatpush3.bf16.msra.mxu0 %v3724_v18 }
  0x30   :  { %3729 = vmatprep.subr.bf16.mxu0 %v3728_v20 }
  0x31   :  { %3381 = vmatmul.mubr.f32.vlgmr.msra.gmra.mrb[0].mxu1 %v4055_v2 }
  0x32   :  { %3740 = vmatpush3.bf16.msra.mxu1 %v4185_v21  ;;  %3391 = vmatprep.mubr.msk.f32.mxu1 %vm4054_vm0, %v4055_v2 }
  0x33   :  { %3741 = vmatprep.subr.bf16.mxu1 %v4053_v1  ;;  %3731 = vmatpush3.bf16.msra.mxu0 %v3728_v20 }
  0x34   :  { %3744 = vmatprep.subr.bf16.mxu0 %v4053_v1 }
  0x36   :  { %3743 = vmatpush3.bf16.msra.mxu1 %v4197_v24 }
  0x37   :  { %3750 = vmatprep.subr.bf16.mxu1 %v4053_v1 }
  0x39   :  { %3392 = vmatmul.mubr.f32.vlgmr.msra.gmra.mrb[2].mxu1 %v4055_v2 }
  0x3a   :  { %3752 = vmatpush3.bf16.msra.mxu1 %v4185_v21  ;;  %3413 = vmatprep.mubr.msk.f32.mxu1 %vm4054_vm0, %v4055_v2 }
  0x3b   :  { %3753 = vmatprep.subr.bf16.mxu1 %v4053_v1 }
  0x3e   :  { %3755 = vmatpush3.bf16.msra.mxu1 %v4197_v24 }
  0x3f   :  { %3762 = vmatprep.subr.bf16.mxu1 %v4053_v1 }
  0x9c   :  { %v4224_v31 = vpop.permute.xlu1 %443 }
  0xa0   :  { %v4226_v32 = vpop.permute.xlu1 %411 }
  0xa7   :  { %v72_v27 = vpop.permute.xlu0 %71 }
  0xa8   :  { %vm94_vm2 = vcmp.eq.s32.totalorder %v72_v27, %v4212_v26 }
  0xa9   :  { %v3134_v28 = vsel %vm94_vm2, 1.0, %v4055_v2 }
  0xaa   :  { %3360 = vmatprep.mubr.msk.f32.mxu0 %vm122_vm1, %v3134_v28 }
  0xab   :  { %v75_v29 = vpop.permute.xlu0 %74 }
  0xac   :  { %vm95_vm3 = vcmp.eq.s32.totalorder %v75_v29, %v4212_v26 }
  0xad   :  { %v3135_v30 = vsel %vm95_vm3, 1.0, %v4055_v2 }
  0xae   :  { %3361 = vmatmul.mubr.msk.f32.vlgmr.msra.gmra.mrb[0].mxu0 %vm122_vm1, %v3135_v30 }
  0xaf   :  { %3746 = vmatpush3.bf16.msra.mxu0 %v4153_v9 }
  0xb0   :  { %3747 = vmatprep.subr.bf16.mxu0 %v4053_v1 }
  0xb3   :  { %3749 = vmatpush3.bf16.msra.mxu0 %v4162_v12 }
  0xb4   :  { %3756 = vmatprep.subr.bf16.mxu0 %v4053_v1 }
 0x104   :  { %v331_v33 = vpop.f32.mrb[0].mxu1 }
 0x105   :  { %v3382_v34 = vpop.f32.mrb[1].mxu1  ;;  %v414_v35 = vadd.f32 %v4226_v32, %v331_v33 }
 0x107   :  { %416 = vrot.lane.b32.xlu1 %v414_v35, %s4056_s28 }
 0x10c   :  { %v401_v36 = vpop.f32.mrb[2].mxu1 }
 0x10d   :  { %v446_v37 = vadd.f32 %v4224_v31, %v401_v36  ;;  %v3393_v38 = vpop.f32.mrb[3].mxu1  ;;  %v435_v40 = vrot.slane %v401_v36, 4 }
 0x10e   :  { %v468_v38 = vld [vmem:[#allocation2 + $0x8] sm:$0xff] }
 0x10f   :  { %v448_v39 = vrot.slane %v446_v37, 4  ;;  %v467_v37 = vld [vmem:[#allocation2] sm:$0xff] }
 0x111   :  { %449 = vrot.lane.b32.xlu0 %v448_v39, %s4056_s28 }
 0x179   :  { %v417_v53 = vpop.permute.xlu1 %416 }
 0x181   :  { %v4232_v41 = vpop.f32.mrb[0].mxu0 }
 0x182   :  { %v213_v42 = vpop.f32.mrb[1].mxu0 }
 0x183   :  { %v405_v43 = vadd.f32 %v331_v33, %v213_v42  ;;  %v437_v44 = vadd.f32 %v435_v40, %v213_v42  ;;  %v450_v52 = vpop.permute.xlu0 %449  ;;  %v3763_v40 = vpack.c.bf16 %v468_v38, %v467_v37 }
 0x185   :  { %v406_v45 = vmul.f32 0.5, %v405_v43  ;;  %v438_v46 = vmul.f32 0.5, %v437_v44  ;;  %v470_v43 = vld [vmem:[#allocation2 + $0x18] sm:$0xff] }
 0x187   :  { %3936 = vtanh.f32 %v406_v45  ;;  %v471_v45 = vld [vmem:[#allocation4] sm:$0xff] }
 0x188   :  { %3938 = vtanh.f32 %v438_v46  ;;  %v472_v46 = vld [vmem:[#allocation4 + $0x8] sm:$0xff] }
 0x191   :  { %v3937_v47 = vpop.eup %3936 }
 0x192   :  { %v3939_v48 = vpop.eup %3938  ;;  %v408_v49 = vadd.f32 1.0, %v3937_v47  ;;  %v3775_v47 = vpack.c.bf16 %v472_v46, %v471_v45 }
 0x193   :  { %v440_v50 = vadd.f32 1.0, %v3939_v48  ;;  %v473_v48 = vld [vmem:[#allocation4 + $0x10] sm:$0xff] }
 0x194   :  { %v409_v51 = vmul.f32 0.5, %v408_v49  ;;  %v474_v49 = vld [vmem:[#allocation4 + $0x18] sm:$0xff] }
 0x195   :  { %v441_v54 = vmul.f32 0.5, %v440_v50  ;;  %v3778_v50 = vpack.c.bf16 %v474_v49, %v473_v48 }
 0x196   :  { %v419_v55 = vmul.f32 %v417_v53, %v409_v51  ;;  %v426_v7 = vsub.f32 1.0, %v409_v51  ;;  %v432_v11 = vmul.f32 0.0, %v409_v51 }
 0x197   :  { %v452_v56 = vmul.f32 %v450_v52, %v441_v54  ;;  %v459_v10 = vsub.f32 1.0, %v441_v54  ;;  %v465_v15 = vmul.f32 0.0, %v441_v54 }
 0x198   :  { %421 = vrot.lane.b32.xlu1 %v419_v55, %s4056_s28 }
 0x199   :  { %454 = vrot.lane.b32.xlu0 %v452_v56, %s4056_s28 }
 0x20a   :  { %v422_v57 = vpop.permute.xlu1 %421 }
 0x20b   :  { %v424_v58 = vadd.f32 %v422_v57, %v213_v42  ;;  %v455_v59 = vpop.permute.xlu0 %454 }
 0x20c   :  { %v457_v60 = vadd.f32 %v455_v59, %v213_v42  ;;  %v469_v42 = vld [vmem:[#allocation2 + $0x10] sm:$0xff] }
 0x20d   :  { %3940 = vtanh.f32 %v424_v58  ;;  %v3766_v44 = vpack.c.bf16 %v470_v43, %v469_v42 }
 0x20e   :  { %3942 = vtanh.f32 %v457_v60 }
 0x217   :  { %v3941_v61 = vpop.eup %3940 }
 0x218   :  { %v3943_v62 = vpop.eup %3942  ;;  %428 = vrot.lane.b32.xlu1 %v3941_v61, %s4057_s1 }
 0x219   :  { %461 = vrot.lane.b32.xlu0 %v3943_v62, %s4057_s1 }
 0x21c   :  { %80 = vperm.xlu1 %3935, %v63_v63  }
 0x21d   :  { %77 = vperm.xlu0 %3934, %v62_v0  }
 0x220   :  { %86 = vperm.xlu1 %3935, %v65_v3  }
 0x221   :  { %83 = vperm.xlu0 %3934, %v64_v4  }
 0x224   :  { %92 = vperm.xlu1 %3935, %v67_v5  }
 0x225   :  { %89 = vperm.xlu0 %3934, %v66_v6  }
 0x28a   :  { %v429_v8 = vpop.permute.xlu1 %428 }
 0x28b   :  { %v431_v13 = vmul.f32 %v429_v8, %v426_v7  ;;  %v462_v14 = vpop.permute.xlu0 %461 }
 0x28c   :  { %v464_v16 = vmul.f32 %v462_v14, %v459_v10 }
 0x28d   :  { %v4256_v17 = vadd.f32 %v432_v11, %v431_v13 }
 0x28e   :  { %v4258_v18 = vadd.f32 %v465_v15, %v464_v16 }
 0x28f   :  { %476 = vrot.lane.b32.xlu1 %v4256_v17, %s4057_s1 }
 0x290   :  { %v551_v19 = vrot.slane %v4258_v18, 4 }
 0x292   :  { %552 = vrot.lane.b32.xlu0 %v551_v19, %s4057_s1 }
 0x29b   :  { %v81_v20 = vpop.permute.xlu1 %80 }
 0x29c   :  { %v78_v22 = vpop.permute.xlu0 %77  ;;  %vm97_vm4 = vcmp.eq.s32.totalorder %v81_v20, %v4212_v26 }
 0x29d   :  { %vm96_vm5 = vcmp.eq.s32.totalorder %v78_v22, %v4212_v26  ;;  %v3137_v23 = vsel %vm97_vm4, 1.0, %v4055_v2 }
 0x29e   :  { %v3136_v25 = vsel %vm96_vm5, 1.0, %v4055_v2 }
 0x29f   :  { %3363 = vmatprep.mubr.msk.f32.mxu0 %vm122_vm1, %v3136_v25  ;;  %v87_v27 = vpop.permute.xlu1 %86 }
 0x2a0   :  { %v84_v28 = vpop.permute.xlu0 %83  ;;  %3364 = vmatmul.mubr.msk.f32.gmra.mrb[2].mxu0 %vm122_vm1, %v3137_v23  ;;  %vm99_vm6 = vcmp.eq.s32.totalorder %v87_v27, %v4212_v26 }
 0x2a1   :  { %vm98_vm7 = vcmp.eq.s32.totalorder %v84_v28, %v4212_v26  ;;  %v3139_v29 = vsel %vm99_vm6, 1.0, %v4055_v2 }
 0x2a2   :  { %v3138_v30 = vsel %vm98_vm7, 1.0, %v4055_v2 }
 0x2a3   :  { %3366 = vmatprep.mubr.msk.f32.mxu0 %vm122_vm1, %v3138_v30  ;;  %v93_v33 = vpop.permute.xlu1 %92 }
 0x2a4   :  { %v90_v34 = vpop.permute.xlu0 %89  ;;  %3367 = vmatmul.mubr.msk.f32.gmra.mrb[4].mxu0 %vm122_vm1, %v3139_v29  ;;  %vm101_vm8 = vcmp.eq.s32.totalorder %v93_v33, %v4212_v26 }
 0x2a5   :  { %vm100_vm9 = vcmp.eq.s32.totalorder %v90_v34, %v4212_v26  ;;  %v3141_v35 = vsel %vm101_vm8, 1.0, %v4055_v2  ;;  %v681_v34 = vld [vmem:[#allocation2 + $0x20] sm:$0xff] }
 0x2a6   :  { %v3140_v36 = vsel %vm100_vm9, 1.0, %v4055_v2 }
 0x2a7   :  { %3369 = vmatprep.mubr.msk.f32.mxu0 %vm122_vm1, %v3140_v36  ;;  %v683_v36 = vld [vmem:[#allocation2 + $0x30] sm:$0xff] }
 0x2a8   :  { %3370 = vmatmul.mubr.msk.f32.gmra.mrb[6].mxu0 %vm122_vm1, %v3141_v35  ;;  %v682_v35 = vld [vmem:[#allocation2 + $0x28] sm:$0xff] }
 0x2a9   :  { %3402 = vmatprep.mubr.msk.f32.mxu0 %vm4054_vm0, %v4055_v2  ;;  %v3757_v38 = vpack.c.bf16 %v682_v35, %v681_v34 }
 0x301   :  { %v477_v39 = vpop.permute.xlu1 %476 }
 0x302   :  { %3403 = vmatmul.mubr.msk.f32.vlgmr.msra.gmra.mrb[8].mxu0 %vm122_vm1, %v477_v39 }
 0x303   :  { %3424 = vmatprep.mubr.msk.f32.mxu0 %vm4054_vm0, %v4055_v2  ;;  %3758 = vmatpush3.bf16.msra.mxu0 %v3757_v38 }
 0x304   :  { %v553_v26 = vpop.permute.xlu0 %552  ;;  %3759 = vmatprep.subr.bf16.mxu0 %v4053_v1 }
 0x305   :  { %3414 = vmatmul.mubr.msk.f32.vlgmr.msra.gmra.mrb[4].mxu1 %vm122_vm1, %v553_v26 }
 0x306   :  { %3764 = vmatpush3.bf16.msra.mxu1 %v3763_v40  ;;  %3435 = vmatprep.mubr.msk.f32.mxu1 %vm4054_vm0, %v4055_v2 }
 0x307   :  { %3765 = vmatprep.subr.bf16.mxu1 %v4053_v1 }
 0x30a   :  { %3767 = vmatpush3.bf16.msra.mxu1 %v3766_v44 }
 0x30b   :  { %3774 = vmatprep.subr.bf16.mxu1 %v4053_v1 }
 0x30d   :  { %3436 = vmatmul.mubr.msk.f32.vlgmr.msra.gmra.mrb[6].mxu1 %vm122_vm1, %v477_v39  ;;  %v684_v39 = vld [vmem:[#allocation2 + $0x38] sm:$0xff] }
 0x30e   :  { %3776 = vmatpush3.bf16.msra.mxu1 %v3775_v47  ;;  %3457 = vmatprep.mubr.msk.f32.mxu1 %vm4054_vm0, %v4055_v2  ;;  %v3760_v40 = vpack.c.bf16 %v684_v39, %v683_v36 }
 0x30f   :  { %3777 = vmatprep.subr.bf16.mxu1 %v4053_v1 }
 0x310   :  { %3761 = vmatpush3.bf16.msra.mxu0 %v3760_v40 }
 0x311   :  { %3768 = vmatprep.subr.bf16.mxu0 %v4053_v1 }
 0x312   :  { %3779 = vmatpush3.bf16.msra.mxu1 %v3778_v50 }
 0x313   :  { %3786 = vmatprep.subr.bf16.mxu1 %v4053_v1 }
 0x315   :  { %3458 = vmatmul.mubr.msk.f32.vlgmr.msra.gmra.mrb[8].mxu1 %vm122_vm1, %v553_v26 }
 0x316   :  { %3788 = vmatpush3.bf16.msra.mxu1 %v4185_v21  ;;  %3479 = vmatprep.mubr.msk.f32.mxu1 %vm4054_vm0, %v4055_v2 }
 0x317   :  { %3789 = vmatprep.subr.bf16.mxu1 %v4053_v1 }
 0x31a   :  { %3791 = vmatpush3.bf16.msra.mxu1 %v4197_v24 }
 0x31b   :  { %3798 = vmatprep.subr.bf16.mxu1 %v4053_v1 }
 0x373   :  { %v4304_v51 = vpop.f32.mrb[2].mxu0 }
 0x374   :  { %v4306_v52 = vpop.f32.mrb[3].mxu0 }
 0x377   :  { %v4308_v53 = vpop.f32.mrb[4].mxu0 }
 0x378   :  { %v4310_v54 = vpop.f32.mrb[5].mxu0 }
 0x37b   :  { %v4312_v55 = vpop.f32.mrb[6].mxu0 }
 0x37c   :  { %v4314_v56 = vpop.f32.mrb[7].mxu0 }
 0x3d5   :  { %v546_v57 = vpop.f32.mrb[8].mxu0 }
 0x3d6   :  { %v626_v58 = vadd.f32 %v4232_v41, %v546_v57  ;;  %v631_v59 = vadd.f32 %v546_v57, %v4226_v32  ;;  %v3404_v60 = vpop.f32.mrb[9].mxu0 }
 0x3d7   :  { %v833_v60 = vld [vmem:[#allocation4 + $0x30] sm:$0xff] }
 0x3d8   :  { %v622_v61 = vpop.f32.mrb[4].mxu1  ;;  %633 = vrot.lane.b32.xlu1 %v631_v59, %s4056_s28  ;;  %v627_v10 = vmul.f32 0.5, %v626_v58  ;;  %v831_v58 = vld [vmem:[#allocation4 + $0x20] sm:$0xff]  ;;  %v832_v59 = vld [vmem:[#allocation4 + $0x28] sm:$0xff] }
 0x3d9   :  { %v652_v62 = vrot.slane %v622_v61, 4  ;;  %v659_v63 = vadd.f32 %v622_v61, %v4224_v31  ;;  %v3415_v0 = vpop.f32.mrb[5].mxu1  ;;  %v834_v61 = vld [vmem:[#allocation4 + $0x38] sm:$0xff] }
 0x3da   :  { %3944 = vtanh.f32 %v627_v10 }
 0x3db   :  { %v654_v3 = vadd.f32 %v4232_v41, %v652_v62  ;;  %v661_v4 = vrot.slane %v659_v63, 4  ;;  %v3772_v63 = vpack.c.bf16 %v834_v61, %v833_v60  ;;  %v1179_v60 = vld [vmem:[#allocation2 + $0x58] sm:$0xff] }
 0x3dd   :  { %662 = vrot.lane.b32.xlu0 %v661_v4, %s4056_s28  ;;  %v655_v11 = vmul.f32 0.5, %v654_v3 }
 0x3df   :  { %3946 = vtanh.f32 %v655_v11 }
 0x3e0   :  { %v4322_v5 = vpop.f32.mrb[6].mxu1 }
 0x3e1   :  { %v3437_v6 = vpop.f32.mrb[7].mxu1 }
 0x3e4   :  { %v3945_v13 = vpop.eup %3944 }
 0x3e5   :  { %v629_v14 = vadd.f32 1.0, %v3945_v13 }
 0x3e7   :  { %v630_v16 = vmul.f32 0.5, %v629_v14 }
 0x3e8   :  { %v4324_v7 = vpop.f32.mrb[8].mxu1 }
 0x3e9   :  { %v3459_v8 = vpop.f32.mrb[9].mxu1  ;;  %v3947_v15 = vpop.eup %3946  ;;  %v649_v26 = vmul.f32 %v630_v16, %v4256_v17  ;;  %v3769_v17 = vpack.c.bf16 %v832_v59, %v831_v58 }
 0x3ea   :  { %v657_v20 = vadd.f32 1.0, %v3947_v15 }
 0x3ec   :  { %v658_v23 = vmul.f32 0.5, %v657_v20 }
 0x3ee   :  { %v672_v46 = vsub.f32 1.0, %v658_v23  ;;  %v678_v48 = vmul.f32 %v658_v23, %v4258_v18 }
 0x44a   :  { %v634_v19 = vpop.permute.xlu1 %633 }
 0x44b   :  { %v636_v22 = vmul.f32 %v634_v19, %v630_v16 }
 0x44d   :  { %638 = vrot.lane.b32.xlu1 %v636_v22, %s4056_s28 }
 0x44f   :  { %v663_v25 = vpop.permute.xlu0 %662 }
 0x450   :  { %v665_v27 = vmul.f32 %v663_v25, %v658_v23 }
 0x452   :  { %667 = vrot.lane.b32.xlu0 %v665_v27, %s4056_s28 }
 0x4bf   :  { %v639_v28 = vpop.permute.xlu1 %638 }
 0x4c0   :  { %v641_v29 = vadd.f32 %v4232_v41, %v639_v28 }
 0x4c2   :  { %3948 = vtanh.f32 %v641_v29 }
 0x4c4   :  { %v668_v30 = vpop.permute.xlu0 %667 }
 0x4c5   :  { %v670_v33 = vadd.f32 %v4232_v41, %v668_v30  ;;  %v643_v41 = vsub.f32 1.0, %v630_v16 }
 0x4c7   :  { %3950 = vtanh.f32 %v670_v33 }
 0x4cc   :  { %v3949_v37 = vpop.eup %3948 }
 0x4cd   :  { %645 = vrot.lane.b32.xlu1 %v3949_v37, %s4057_s1 }
 0x4d1   :  { %v3951_v42 = vpop.eup %3950 }
 0x4d2   :  { %674 = vrot.lane.b32.xlu0 %v3951_v42, %s4057_s1 }
 0x53f   :  { %v646_v43 = vpop.permute.xlu1 %645 }
 0x540   :  { %v648_v44 = vmul.f32 %v646_v43, %v643_v41  ;;  %v1257_v43 = vld [vmem:[#allocation4 + $0x40] sm:$0xff] }
 0x542   :  { %v4335_v45 = vadd.f32 %v649_v26, %v648_v44  ;;  %v1258_v26 = vld [vmem:[#allocation4 + $0x48] sm:$0xff]  ;;  %v1259_v44 = vld [vmem:[#allocation4 + $0x50] sm:$0xff] }
 0x544   :  { %v675_v47 = vpop.permute.xlu0 %674  ;;  %686 = vrot.lane.b32.xlu1 %v4335_v45, %s4057_s1 }
 0x545   :  { %v677_v49 = vmul.f32 %v675_v47, %v672_v46  ;;  %v3799_v47 = vpack.c.bf16 %v1258_v26, %v1257_v43 }
 0x547   :  { %v4340_v50 = vadd.f32 %v678_v48, %v677_v49  ;;  %v1260_v48 = vld [vmem:[#allocation4 + $0x58] sm:$0xff]  ;;  %v1176_v49 = vld [vmem:[#allocation2 + $0x40] sm:$0xff] }
 0x548   :  { %v3802_v59 = vpack.c.bf16 %v1260_v48, %v1259_v44 }
 0x549   :  { %v836_v57 = vrot.slane %v4340_v50, 4 }
 0x54b   :  { %837 = vrot.lane.b32.xlu0 %v836_v57, %s4057_s1  ;;  %v1177_v57 = vld [vmem:[#allocation2 + $0x48] sm:$0xff] }
 0x54c   :  { %v3793_v58 = vpack.c.bf16 %v1177_v57, %v1176_v49 }
 0x5b6   :  { %v687_v62 = vpop.permute.xlu1 %686 }
 0x5b7   :  { %3425 = vmatmul.mubr.msk.f32.vlgmr.msra.gmra.mrb[10].mxu0 %vm122_vm1, %v687_v62 }
 0x5b8   :  { %3770 = vmatpush3.bf16.msra.mxu0 %v3769_v17  ;;  %3446 = vmatprep.mubr.msk.f32.mxu0 %vm4054_vm0, %v4055_v2  ;;  %v1178_v17 = vld [vmem:[#allocation2 + $0x50] sm:$0xff] }
 0x5b9   :  { %3771 = vmatprep.subr.bf16.mxu0 %v4053_v1  ;;  %v3796_v61 = vpack.c.bf16 %v1179_v60, %v1178_v17  ;;  %v1534_v60 = vld [vmem:[#allocation2 + $0x68] sm:$0xff] }
 0x5bc   :  { %3773 = vmatpush3.bf16.msra.mxu0 %v3772_v63 }
 0x5bd   :  { %v838_v18 = vpop.permute.xlu0 %837  ;;  %3780 = vmatprep.subr.bf16.mxu0 %v4053_v1 }
 0x5be   :  { %3480 = vmatmul.mubr.msk.f32.vlgmr.msra.gmra.mrb[10].mxu1 %vm122_vm1, %v838_v18 }
 0x5bf   :  { %3447 = vmatmul.mubr.msk.f32.vlgmr.msra.gmra.mrb[12].mxu0 %vm122_vm1, %v838_v18  ;;  %3501 = vmatprep.mubr.msk.f32.mxu1 %vm4054_vm0, %v4055_v2 }
 0x5c0   :  { %3782 = vmatpush3.bf16.msra.mxu0 %v4153_v9  ;;  %3468 = vmatprep.mubr.msk.f32.mxu0 %vm4054_vm0, %v4055_v2 }
 0x5c1   :  { %3783 = vmatprep.subr.bf16.mxu0 %v4053_v1  ;;  %3800 = vmatpush3.bf16.msra.mxu1 %v3799_v47 }
 0x5c2   :  { %3801 = vmatprep.subr.bf16.mxu1 %v4053_v1 }
 0x5c4   :  { %3785 = vmatpush3.bf16.msra.mxu0 %v4162_v12 }
 0x5c5   :  { %3792 = vmatprep.subr.bf16.mxu0 %v4053_v1  ;;  %3803 = vmatpush3.bf16.msra.mxu1 %v3802_v59  ;;  %v1615_v59 = vld [vmem:[#allocation4 + $0x68] sm:$0xff] }
 0x5c6   :  { %3810 = vmatprep.subr.bf16.mxu1 %v4053_v1 }
 0x5c7   :  { %3469 = vmatmul.mubr.msk.f32.vlgmr.msra.gmra.mrb[14].mxu0 %vm122_vm1, %v687_v62 }
 0x5c8   :  { %3490 = vmatprep.mubr.msk.f32.mxu0 %vm4054_vm0, %v4055_v2  ;;  %3794 = vmatpush3.bf16.msra.mxu0 %v3793_v58  ;;  %v1614_v58 = vld [vmem:[#allocation4 + $0x60] sm:$0xff] }
 0x5c9   :  { %3795 = vmatprep.subr.bf16.mxu0 %v4053_v1  ;;  %v3823_v17 = vpack.c.bf16 %v1615_v59, %v1614_v58 }
 0x5cc   :  { %3797 = vmatpush3.bf16.msra.mxu0 %v3796_v61  ;;  %v1616_v61 = vld [vmem:[#allocation4 + $0x70] sm:$0xff] }
 0x5cd   :  { %3804 = vmatprep.subr.bf16.mxu0 %v4053_v1 }
 0x68a   :  { %v756_v0 = vpop.f32.mrb[10].mxu0 }
 0x68b   :  { %v4363_v3 = vadd.f32 %v4322_v5, %v756_v0  ;;  %v3426_v4 = vpop.f32.mrb[11].mxu0 }
 0x691   :  { %v1117_v6 = vpop.f32.mrb[10].mxu1 }
 0x692   :  { %v1147_v8 = vrot.slane %v1117_v6, 4  ;;  %v1154_v10 = vadd.f32 %v1117_v6, %v4224_v31  ;;  %v907_v11 = vpop.f32.mrb[12].mxu0  ;;  %v3481_v13 = vpop.f32.mrb[11].mxu1 }
 0x693   :  { %v4367_v14 = vadd.f32 %v4324_v7, %v907_v11  ;;  %v3448_v15 = vpop.f32.mrb[13].mxu0 }
 0x694   :  { %v1149_v16 = vadd.f32 %v1147_v8, %v4306_v52  ;;  %v1156_v19 = vrot.slane %v1154_v10, 4 }
 0x696   :  { %1157 = vrot.lane.b32.xlu0 %v1156_v19, %s4056_s28  ;;  %v1150_v25 = vmul.f32 0.5, %v1149_v16 }
 0x698   :  { %3952 = vtanh.f32 %v1150_v25 }
 0x69a   :  { %v1047_v20 = vpop.f32.mrb[14].mxu0 }
 0x69b   :  { %v1121_v5 = vadd.f32 %v1047_v20, %v4306_v52  ;;  %v1126_v22 = vadd.f32 %v1047_v20, %v4226_v32  ;;  %v3470_v23 = vpop.f32.mrb[15].mxu0 }
 0x69d   :  { %1128 = vrot.lane.b32.xlu1 %v1126_v22, %s4056_s28  ;;  %v1122_v27 = vmul.f32 0.5, %v1121_v5 }
 0x69f   :  { %3954 = vtanh.f32 %v1122_v27 }
 0x6a2   :  { %v3953_v7 = vpop.eup %3952 }
 0x6a3   :  { %v1152_v28 = vadd.f32 1.0, %v3953_v7 }
 0x6a5   :  { %v1153_v30 = vmul.f32 0.5, %v1152_v28 }
 0x6a7   :  { %v1167_v62 = vsub.f32 1.0, %v1153_v30  ;;  %v1173_v18 = vmul.f32 %v1153_v30, %v4340_v50 }
 0x6a9   :  { %v3955_v29 = vpop.eup %3954 }
 0x6aa   :  { %v1124_v35 = vadd.f32 1.0, %v3955_v29 }
 0x6ac   :  { %v1125_v36 = vmul.f32 0.5, %v1124_v35 }
 0x6ae   :  { %v1138_v8 = vsub.f32 1.0, %v1125_v36  ;;  %v1144_v11 = vmul.f32 %v1125_v36, %v4335_v45 }
 0x708   :  { %v1158_v33 = vpop.permute.xlu0 %1157 }
 0x709   :  { %v1160_v34 = vmul.f32 %v1158_v33, %v1153_v30 }
 0x70b   :  { %1162 = vrot.lane.b32.xlu0 %v1160_v34, %s4056_s28 }
 0x70f   :  { %v1129_v37 = vpop.permute.xlu1 %1128 }
 0x710   :  { %v1131_v38 = vmul.f32 %v1129_v37, %v1125_v36 }
 0x712   :  { %1133 = vrot.lane.b32.xlu1 %v1131_v38, %s4056_s28 }
 0x77d   :  { %v1163_v39 = vpop.permute.xlu0 %1162 }
 0x77e   :  { %v1165_v40 = vadd.f32 %v1163_v39, %v4306_v52 }
 0x780   :  { %3956 = vtanh.f32 %v1165_v40 }
 0x784   :  { %v1134_v42 = vpop.permute.xlu1 %1133 }
 0x785   :  { %v1136_v41 = vadd.f32 %v1134_v42, %v4306_v52 }
 0x787   :  { %3958 = vtanh.f32 %v1136_v41 }
 0x78a   :  { %v3957_v46 = vpop.eup %3956 }
 0x78b   :  { %1169 = vrot.lane.b32.xlu0 %v3957_v46, %s4057_s1 }
 0x791   :  { %v3959_v52 = vpop.eup %3958 }
 0x792   :  { %1140 = vrot.lane.b32.xlu1 %v3959_v52, %s4057_s1  ;;  %v1533_v52 = vld [vmem:[#allocation2 + $0x60] sm:$0xff] }
 0x7fd   :  { %v1170_v63 = vpop.permute.xlu0 %1169 }
 0x7fe   :  { %v1172_v0 = vmul.f32 %v1170_v63, %v1167_v62  ;;  %v1617_v62 = vld [vmem:[#allocation4 + $0x78] sm:$0xff]  ;;  %v3817_v63 = vpack.c.bf16 %v1534_v60, %v1533_v52 }
 0x800   :  { %v4385_v4 = vadd.f32 %v1173_v18, %v1172_v0  ;;  %v1535_v18 = vld [vmem:[#allocation2 + $0x70] sm:$0xff]  ;;  %v1536_v0 = vld [vmem:[#allocation2 + $0x78] sm:$0xff] }
 0x802   :  { %v1262_v6 = vrot.slane %v4385_v4, 4 }
 0x804   :  { %v1141_v10 = vpop.permute.xlu1 %1140  ;;  %1263 = vrot.lane.b32.xlu0 %v1262_v6, %s4057_s1  ;;  %v3826_v6 = vpack.c.bf16 %v1617_v62, %v1616_v61 }
 0x805   :  { %v1143_v13 = vmul.f32 %v1141_v10, %v1138_v8  ;;  %v3820_v8 = vpack.c.bf16 %v1536_v0, %v1535_v18  ;;  %v1891_v18 = vld [vmem:[#allocation2 + $0x88] sm:$0xff]  ;;  %v1971_v0 = vld [vmem:[#allocation4 + $0x80] sm:$0xff] }
 0x807   :  { %v4390_v15 = vadd.f32 %v1144_v11, %v1143_v13 }
 0x809   :  { %1181 = vrot.lane.b32.xlu1 %v4390_v15, %s4057_s1 }
 0x876   :  { %v1264_v16 = vpop.permute.xlu0 %1263 }
 0x877   :  { %3502 = vmatmul.mubr.msk.f32.vlgmr.msra.gmra.mrb[12].mxu1 %vm122_vm1, %v1264_v16 }
 0x878   :  { %3812 = vmatpush3.bf16.msra.mxu1 %v4185_v21  ;;  %3523 = vmatprep.mubr.msk.f32.mxu1 %vm4054_vm0, %v4055_v2 }
 0x879   :  { %3813 = vmatprep.subr.bf16.mxu1 %v4053_v1 }
 0x87b   :  { %v1182_v50 = vpop.permute.xlu1 %1181 }
 0x87c   :  { %3815 = vmatpush3.bf16.msra.mxu1 %v4197_v24  ;;  %3491 = vmatmul.mubr.msk.f32.vlgmr.msra.gmra.mrb[16].mxu0 %vm122_vm1, %v1182_v50 }
 0x87d   :  { %3806 = vmatpush3.bf16.msra.mxu0 %v4153_v9  ;;  %3512 = vmatprep.mubr.msk.f32.mxu0 %vm4054_vm0, %v4055_v2 }
 0x87e   :  { %3807 = vmatprep.subr.bf16.mxu0 %v4053_v1  ;;  %3822 = vmatprep.subr.bf16.mxu1 %v4053_v1 }
 0x87f   :  { %3524 = vmatmul.mubr.msk.f32.vlgmr.msra.gmra.mrb[14].mxu1 %vm122_vm1, %v1264_v16 }
 0x880   :  { %3545 = vmatprep.mubr.msk.f32.mxu1 %vm4054_vm0, %v4055_v2  ;;  %3824 = vmatpush3.bf16.msra.mxu1 %v3823_v17 }
 0x881   :  { %3809 = vmatpush3.bf16.msra.mxu0 %v4162_v12  ;;  %3825 = vmatprep.subr.bf16.mxu1 %v4053_v1 }
 0x882   :  { %3816 = vmatprep.subr.bf16.mxu0 %v4053_v1 }
 0x884   :  { %3513 = vmatmul.mubr.msk.f32.vlgmr.msra.gmra.mrb[18].mxu0 %vm122_vm1, %v1182_v50  ;;  %3827 = vmatpush3.bf16.msra.mxu1 %v3826_v6 }
 0x885   :  { %3534 = vmatprep.mubr.msk.f32.mxu0 %vm4054_vm0, %v4055_v2  ;;  %3818 = vmatpush3.bf16.msra.mxu0 %v3817_v63  ;;  %v1890_v63 = vld [vmem:[#allocation2 + $0x80] sm:$0xff] }
 0x886   :  { %3819 = vmatprep.subr.bf16.mxu0 %v4053_v1  ;;  %3834 = vmatprep.subr.bf16.mxu1 %v4053_v1  ;;  %v3841_v6 = vpack.c.bf16 %v1891_v18, %v1890_v63 }
 0x889   :  { %3821 = vmatpush3.bf16.msra.mxu0 %v3820_v8  ;;  %v1972_v8 = vld [vmem:[#allocation4 + $0x88] sm:$0xff] }
 0x88a   :  { %3828 = vmatprep.subr.bf16.mxu0 %v4053_v1 }
 0x94a   :  { %v1333_v45 = vpop.f32.mrb[12].mxu1 }
 0x94b   :  { %v4415_v19 = vadd.f32 %v1333_v45, %v4367_v14  ;;  %v3503_v20 = vpop.f32.mrb[13].mxu1 }
 0x94f   :  { %v1251_v5 = vpop.f32.mrb[16].mxu0 }
 0x950   :  { %v4418_v22 = vadd.f32 %v1251_v5, %v4363_v3  ;;  %v3492_v23 = vpop.f32.mrb[17].mxu0 }
 0x952   :  { %v1474_v25 = vpop.f32.mrb[14].mxu1 }
 0x953   :  { %v1504_v27 = vrot.slane %v1474_v25, 4  ;;  %v1511_v7 = vadd.f32 %v1474_v25, %v4224_v31  ;;  %v3525_v28 = vpop.f32.mrb[15].mxu1 }
 0x955   :  { %v1506_v29 = vadd.f32 %v4304_v51, %v1504_v27  ;;  %v1513_v30 = vrot.slane %v1511_v7, 4 }
 0x957   :  { %v1404_v33 = vpop.f32.mrb[18].mxu0  ;;  %1514 = vrot.lane.b32.xlu0 %v1513_v30, %s4056_s28  ;;  %v1507_v3 = vmul.f32 0.5, %v1506_v29 }
 0x958   :  { %v1478_v14 = vadd.f32 %v4304_v51, %v1404_v33  ;;  %v1483_v34 = vadd.f32 %v1404_v33, %v4226_v32  ;;  %v3514_v35 = vpop.f32.mrb[19].mxu0 }
 0x959   :  { %3960 = vtanh.f32 %v1507_v3 }
 0x95a   :  { %1485 = vrot.lane.b32.xlu1 %v1483_v34, %s4056_s28  ;;  %v1479_v36 = vmul.f32 0.5, %v1478_v14 }
 0x95c   :  { %3962 = vtanh.f32 %v1479_v36 }
 0x963   :  { %v3961_v37 = vpop.eup %3960 }
 0x964   :  { %v1509_v39 = vadd.f32 1.0, %v3961_v37 }
 0x966   :  { %v3963_v38 = vpop.eup %3962  ;;  %v1510_v42 = vmul.f32 0.5, %v1509_v39 }
 0x967   :  { %v1481_v40 = vadd.f32 1.0, %v3963_v38 }
 0x968   :  { %v1524_v11 = vsub.f32 1.0, %v1510_v42  ;;  %v1530_v16 = vmul.f32 %v1510_v42, %v4385_v4 }
 0x969   :  { %v1482_v26 = vmul.f32 0.5, %v1481_v40 }
 0x96b   :  { %v1495_v45 = vsub.f32 1.0, %v1482_v26  ;;  %v1501_v23 = vmul.f32 %v1482_v26, %v4390_v15 }
 0x9c9   :  { %v1515_v41 = vpop.permute.xlu0 %1514 }
 0x9ca   :  { %v1517_v43 = vmul.f32 %v1515_v41, %v1510_v42 }
 0x9cc   :  { %v1486_v44 = vpop.permute.xlu1 %1485  ;;  %1519 = vrot.lane.b32.xlu0 %v1517_v43, %s4056_s28 }
 0x9cd   :  { %v1488_v46 = vmul.f32 %v1486_v44, %v1482_v26 }
 0x9cf   :  { %1490 = vrot.lane.b32.xlu1 %v1488_v46, %s4056_s28 }
 0xa3e   :  { %v1520_v47 = vpop.permute.xlu0 %1519 }
 0xa3f   :  { %v1522_v48 = vadd.f32 %v4304_v51, %v1520_v47 }
 0xa41   :  { %3964 = vtanh.f32 %v1522_v48  ;;  %v1491_v49 = vpop.permute.xlu1 %1490 }
 0xa42   :  { %v1493_v57 = vadd.f32 %v4304_v51, %v1491_v49 }
 0xa44   :  { %3966 = vtanh.f32 %v1493_v57 }
 0xa4b   :  { %v3965_v10 = vpop.eup %3964 }
 0xa4c   :  { %1526 = vrot.lane.b32.xlu0 %v3965_v10, %s4057_s1  ;;  %v1892_v10 = vld [vmem:[#allocation2 + $0x90] sm:$0xff] }
 0xa4e   :  { %v3967_v51 = vpop.eup %3966 }
 0xa4f   :  { %1497 = vrot.lane.b32.xlu1 %v3967_v51, %s4057_s1  ;;  %v1893_v51 = vld [vmem:[#allocation2 + $0x98] sm:$0xff] }
 0xabe   :  { %v1527_v13 = vpop.permute.xlu0 %1526 }
 0xabf   :  { %v1529_v50 = vmul.f32 %v1527_v13, %v1524_v11  ;;  %v3847_v11 = vpack.c.bf16 %v1972_v8, %v1971_v0  ;;  %v3844_v13 = vpack.c.bf16 %v1893_v51, %v1892_v10  ;;  %v2247_v51 = vld [vmem:[#allocation2 + $0xa0] sm:$0xff] }
 0xac1   :  { %v4437_v20 = vadd.f32 %v1530_v16, %v1529_v50  ;;  %v1498_v5 = vpop.permute.xlu1 %1497 }
 0xac2   :  { %v1500_v25 = vmul.f32 %v1498_v5, %v1495_v45  ;;  %v1974_v45 = vld [vmem:[#allocation4 + $0x98] sm:$0xff] }
 0xac3   :  { %v1619_v27 = vrot.slane %v4437_v20, 4 }
 0xac4   :  { %v4441_v7 = vadd.f32 %v1501_v23, %v1500_v25 }
 0xac5   :  { %1620 = vrot.lane.b32.xlu0 %v1619_v27, %s4057_s1 }
 0xac6   :  { %1538 = vrot.lane.b32.xlu1 %v4441_v7, %s4057_s1 }
 0xb37   :  { %v1621_v28 = vpop.permute.xlu0 %1620 }
 0xb38   :  { %v1539_v29 = vpop.permute.xlu1 %1538  ;;  %3546 = vmatmul.mubr.msk.f32.vlgmr.msra.gmra.mrb[16].mxu1 %vm122_vm1, %v1621_v28 }
 0xb39   :  { %3836 = vmatpush3.bf16.msra.mxu1 %v4185_v21  ;;  %3535 = vmatmul.mubr.msk.f32.vlgmr.msra.gmra.mrb[20].mxu0 %vm122_vm1, %v1539_v29 }
 0xb3a   :  { %3830 = vmatpush3.bf16.msra.mxu0 %v4153_v9  ;;  %3837 = vmatprep.subr.bf16.mxu1 %v4053_v1 }
 0xb3b   :  { %3831 = vmatprep.subr.bf16.mxu0 %v4053_v1  ;;  %3567 = vmatprep.mubr.msk.f32.mxu1 %vm4054_vm0, %v4055_v2 }
 0xb3c   :  { %3556 = vmatprep.mubr.msk.f32.mxu0 %vm4054_vm0, %v4055_v2 }
 0xb3d   :  { %3839 = vmatpush3.bf16.msra.mxu1 %v4197_v24 }
 0xb3e   :  { %3833 = vmatpush3.bf16.msra.mxu0 %v4162_v12  ;;  %3846 = vmatprep.subr.bf16.mxu1 %v4053_v1 }
 0xb3f   :  { %3840 = vmatprep.subr.bf16.mxu0 %v4053_v1 }
 0xb40   :  { %3568 = vmatmul.mubr.msk.f32.vlgmr.msra.gmra.mrb[18].mxu1 %vm122_vm1, %v1621_v28 }
 0xb41   :  { %3557 = vmatmul.mubr.msk.f32.vlgmr.msra.gmra.mrb[22].mxu0 %vm122_vm1, %v1539_v29  ;;  %3589 = vmatprep.mubr.msk.f32.mxu1 %vm4054_vm0, %v4055_v2 }
 0xb42   :  { %3578 = vmatprep.mubr.msk.f32.mxu0 %vm4054_vm0, %v4055_v2  ;;  %3842 = vmatpush3.bf16.msra.mxu0 %v3841_v6 }
 0xb43   :  { %3843 = vmatprep.subr.bf16.mxu0 %v4053_v1  ;;  %3848 = vmatpush3.bf16.msra.mxu1 %v3847_v11  ;;  %v2248_v11 = vld [vmem:[#allocation2 + $0xa8] sm:$0xff] }
 0xb44   :  { %3849 = vmatprep.subr.bf16.mxu1 %v4053_v1 }
 0xb46   :  { %3845 = vmatpush3.bf16.msra.mxu0 %v3844_v13  ;;  %v2249_v13 = vld [vmem:[#allocation2 + $0xb0] sm:$0xff] }
 0xb47   :  { %3852 = vmatprep.subr.bf16.mxu0 %v4053_v1 }
 0xc0b   :  { %v1690_v4 = vpop.f32.mrb[16].mxu1 }
 0xc0c   :  { %v4467_v15 = vadd.f32 %v1690_v4, %v4415_v19  ;;  %v1608_v30 = vpop.f32.mrb[20].mxu0  ;;  %v3547_v33 = vpop.f32.mrb[17].mxu1 }
 0xc0d   :  { %v4470_v14 = vadd.f32 %v1608_v30, %v4418_v22  ;;  %v3536_v34 = vpop.f32.mrb[21].mxu0 }
 0xc13   :  { %v1831_v35 = vpop.f32.mrb[18].mxu1 }
 0xc14   :  { %v1861_v3 = vrot.slane %v1831_v35, 4  ;;  %v1868_v36 = vadd.f32 %v1831_v35, %v4224_v31  ;;  %v1761_v37 = vpop.f32.mrb[22].mxu0  ;;  %v3569_v38 = vpop.f32.mrb[19].mxu1 }
 0xc15   :  { %v1835_v39 = vadd.f32 %v1761_v37, %v4310_v54  ;;  %v1840_v40 = vadd.f32 %v1761_v37, %v4226_v32  ;;  %v3558_v42 = vpop.f32.mrb[23].mxu0 }
 0xc16   :  { %v1863_v19 = vadd.f32 %v1861_v3, %v4310_v54  ;;  %v1870_v41 = vrot.slane %v1868_v36, 4 }
 0xc17   :  { %1842 = vrot.lane.b32.xlu1 %v1840_v40, %s4056_s28  ;;  %v1836_v22 = vmul.f32 0.5, %v1835_v39 }
 0xc18   :  { %1871 = vrot.lane.b32.xlu0 %v1870_v41, %s4056_s28  ;;  %v1864_v43 = vmul.f32 0.5, %v1863_v19 }
 0xc19   :  { %3968 = vtanh.f32 %v1836_v22 }
 0xc1a   :  { %3970 = vtanh.f32 %v1864_v43 }
 0xc23   :  { %v3969_v26 = vpop.eup %3968 }
 0xc24   :  { %v3971_v44 = vpop.eup %3970  ;;  %v1838_v46 = vadd.f32 1.0, %v3969_v26 }
 0xc25   :  { %v1866_v47 = vadd.f32 1.0, %v3971_v44 }
 0xc26   :  { %v1839_v48 = vmul.f32 0.5, %v1838_v46 }
 0xc27   :  { %v1867_v57 = vmul.f32 0.5, %v1866_v47 }
 0xc28   :  { %v1852_v23 = vsub.f32 1.0, %v1839_v48  ;;  %v1858_v28 = vmul.f32 %v1839_v48, %v4441_v7 }
 0xc29   :  { %v1881_v27 = vsub.f32 1.0, %v1867_v57  ;;  %v1887_v30 = vmul.f32 %v1867_v57, %v4437_v20 }
 0xc89   :  { %v1843_v49 = vpop.permute.xlu1 %1842 }
 0xc8a   :  { %v1845_v58 = vmul.f32 %v1843_v49, %v1839_v48  ;;  %v1872_v59 = vpop.permute.xlu0 %1871 }
 0xc8b   :  { %v1874_v52 = vmul.f32 %v1872_v59, %v1867_v57 }
 0xc8c   :  { %1847 = vrot.lane.b32.xlu1 %v1845_v58, %s4056_s28 }
 0xc8d   :  { %1876 = vrot.lane.b32.xlu0 %v1874_v52, %s4056_s28 }
 0xcfe   :  { %v1848_v17 = vpop.permute.xlu1 %1847 }
 0xcff   :  { %v1850_v60 = vadd.f32 %v1848_v17, %v4310_v54  ;;  %v1877_v61 = vpop.permute.xlu0 %1876 }
 0xd00   :  { %v1879_v62 = vadd.f32 %v1877_v61, %v4310_v54  ;;  %v1973_v54 = vld [vmem:[#allocation4 + $0x90] sm:$0xff] }
 0xd01   :  { %3972 = vtanh.f32 %v1850_v60  ;;  %v3850_v5 = vpack.c.bf16 %v1974_v45, %v1973_v54  ;;  %v2250_v54 = vld [vmem:[#allocation2 + $0xb8] sm:$0xff] }
 0xd02   :  { %3974 = vtanh.f32 %v1879_v62  ;;  %v3868_v45 = vpack.c.bf16 %v2250_v54, %v2249_v13 }
 0xd03   :  { %3851 = vmatpush3.bf16.msra.mxu1 %v3850_v5 }
 0xd04   :  { %3858 = vmatprep.subr.bf16.mxu1 %v4053_v1 }
 0xd0b   :  { %v3973_v16 = vpop.eup %3972 }
 0xd0c   :  { %v3975_v50 = vpop.eup %3974  ;;  %1854 = vrot.lane.b32.xlu1 %v3973_v16, %s4057_s1 }
 0xd0d   :  { %1883 = vrot.lane.b32.xlu0 %v3975_v50, %s4057_s1  ;;  %v3865_v50 = vpack.c.bf16 %v2248_v11, %v2247_v51 }
 0xd7e   :  { %v1855_v25 = vpop.permute.xlu1 %1854 }
 0xd7f   :  { %v1857_v29 = vmul.f32 %v1855_v25, %v1852_v23  ;;  %v1884_v4 = vpop.permute.xlu0 %1883  ;;  %v2329_v23 = vld [vmem:[#allocation4 + $0xa8] sm:$0xff] }
 0xd80   :  { %v1886_v33 = vmul.f32 %v1884_v4, %v1881_v27  ;;  %v2330_v27 = vld [vmem:[#allocation4 + $0xb0] sm:$0xff] }
 0xd81   :  { %v4490_v34 = vadd.f32 %v1858_v28, %v1857_v29  ;;  %v2331_v28 = vld [vmem:[#allocation4 + $0xb8] sm:$0xff] }
 0xd82   :  { %v4492_v35 = vadd.f32 %v1887_v30, %v1886_v33  ;;  %v3874_v29 = vpack.c.bf16 %v2331_v28, %v2330_v27 }
 0xd83   :  { %1895 = vrot.lane.b32.xlu1 %v4490_v34, %s4057_s1 }
 0xd84   :  { %v1976_v3 = vrot.slane %v4492_v35, 4 }
 0xd86   :  { %1977 = vrot.lane.b32.xlu0 %v1976_v3, %s4057_s1 }
 0xdf5   :  { %v1896_v36 = vpop.permute.xlu1 %1895 }
 0xdf6   :  { %3579 = vmatmul.mubr.msk.f32.vlgmr.msra.gmra.mrb[24].mxu0 %vm122_vm1, %v1896_v36 }
 0xdf7   :  { %3854 = vmatpush3.bf16.msra.mxu0 %v4153_v9  ;;  %3600 = vmatprep.mubr.msk.f32.mxu0 %vm4054_vm0, %v4055_v2 }
 0xdf8   :  { %v1978_v20 = vpop.permute.xlu0 %1977  ;;  %3855 = vmatprep.subr.bf16.mxu0 %v4053_v1 }
 0xdf9   :  { %3590 = vmatmul.mubr.msk.f32.vlgmr.msra.gmra.mrb[20].mxu1 %vm122_vm1, %v1978_v20 }
 0xdfa   :  { %3860 = vmatpush3.bf16.msra.mxu1 %v4185_v21  ;;  %3611 = vmatprep.mubr.msk.f32.mxu1 %vm4054_vm0, %v4055_v2 }
 0xdfb   :  { %3857 = vmatpush3.bf16.msra.mxu0 %v4162_v12  ;;  %3861 = vmatprep.subr.bf16.mxu1 %v4053_v1 }
 0xdfc   :  { %3864 = vmatprep.subr.bf16.mxu0 %v4053_v1 }
 0xdfe   :  { %3601 = vmatmul.mubr.msk.f32.vlgmr.msra.gmra.mrb[26].mxu0 %vm122_vm1, %v1896_v36  ;;  %3863 = vmatpush3.bf16.msra.mxu1 %v4197_v24 }
 0xdff   :  { %3870 = vmatprep.subr.bf16.mxu1 %v4053_v1  ;;  %3622 = vmatprep.mubr.msk.f32.mxu0 %vm4054_vm0, %v4055_v2 }
 0xe00   :  { %3866 = vmatpush3.bf16.msra.mxu0 %v3865_v50 }
 0xe01   :  { %3612 = vmatmul.mubr.msk.f32.vlgmr.msra.gmra.mrb[22].mxu1 %vm122_vm1, %v1978_v20  ;;  %3867 = vmatprep.subr.bf16.mxu0 %v4053_v1 }
 0xe02   :  { %3633 = vmatprep.mubr.msk.f32.mxu1 %vm4054_vm0, %v4055_v2 }
 0xe04   :  { %3869 = vmatpush3.bf16.msra.mxu0 %v3868_v45  ;;  %v2604_v45 = vld [vmem:[#allocation2 + $0xc0] sm:$0xff] }
 0xe05   :  { %3876 = vmatprep.subr.bf16.mxu0 %v4053_v1 }
 0xec9   :  { %v1965_v7 = vpop.f32.mrb[24].mxu0 }
 0xeca   :  { %v4519_v37 = vadd.f32 %v1965_v7, %v4470_v14  ;;  %v3580_v38 = vpop.f32.mrb[25].mxu0 }
 0xecc   :  { %v2047_v39 = vpop.f32.mrb[20].mxu1 }
 0xecd   :  { %v4522_v40 = vadd.f32 %v2047_v39, %v4467_v15  ;;  %v3591_v42 = vpop.f32.mrb[21].mxu1 }
 0xed1   :  { %v2118_v19 = vpop.f32.mrb[26].mxu0 }
 0xed2   :  { %v2192_v41 = vadd.f32 %v4308_v53, %v2118_v19  ;;  %v2197_v22 = vadd.f32 %v2118_v19, %v4226_v32  ;;  %v3602_v43 = vpop.f32.mrb[27].mxu0 }
 0xed4   :  { %2199 = vrot.lane.b32.xlu1 %v2197_v22, %s4056_s28  ;;  %v2188_v26 = vpop.f32.mrb[22].mxu1  ;;  %v2193_v15 = vmul.f32 0.5, %v2192_v41 }
 0xed5   :  { %v2218_v44 = vrot.slane %v2188_v26, 4  ;;  %v2225_v46 = vadd.f32 %v2188_v26, %v4224_v31  ;;  %v3613_v14 = vpop.f32.mrb[23].mxu1 }
 0xed6   :  { %3976 = vtanh.f32 %v2193_v15 }
 0xed7   :  { %v2220_v47 = vadd.f32 %v4308_v53, %v2218_v44  ;;  %v2227_v48 = vrot.slane %v2225_v46, 4 }
 0xed9   :  { %2228 = vrot.lane.b32.xlu0 %v2227_v48, %s4056_s28  ;;  %v2221_v49 = vmul.f32 0.5, %v2220_v47 }
 0xedb   :  { %3978 = vtanh.f32 %v2221_v49 }
 0xee0   :  { %v3977_v57 = vpop.eup %3976 }
 0xee1   :  { %v2195_v58 = vadd.f32 1.0, %v3977_v57 }
 0xee3   :  { %v2196_v52 = vmul.f32 0.5, %v2195_v58 }
 0xee5   :  { %v3979_v59 = vpop.eup %3978  ;;  %v2209_v4 = vsub.f32 1.0, %v2196_v52  ;;  %v2215_v33 = vmul.f32 %v2196_v52, %v4490_v34 }
 0xee6   :  { %v2223_v60 = vadd.f32 1.0, %v3979_v59 }
 0xee8   :  { %v2224_v62 = vmul.f32 0.5, %v2223_v60 }
 0xeea   :  { %v2238_v20 = vsub.f32 1.0, %v2224_v62  ;;  %v2244_v38 = vmul.f32 %v2224_v62, %v4492_v35 }
 0xf46   :  { %v2200_v17 = vpop.permute.xlu1 %2199 }
 0xf47   :  { %v2202_v61 = vmul.f32 %v2200_v17, %v2196_v52 }
 0xf49   :  { %2204 = vrot.lane.b32.xlu1 %v2202_v61, %s4056_s28 }
 0xf4b   :  { %v2229_v63 = vpop.permute.xlu0 %2228 }
 0xf4c   :  { %v2231_v18 = vmul.f32 %v2229_v63, %v2224_v62 }
 0xf4e   :  { %2233 = vrot.lane.b32.xlu0 %v2231_v18, %s4056_s28 }
 0xfbb   :  { %v2205_v0 = vpop.permute.xlu1 %2204 }
 0xfbc   :  { %v2207_v6 = vadd.f32 %v4308_v53, %v2205_v0 }
 0xfbe   :  { %3980 = vtanh.f32 %v2207_v6 }
 0xfc0   :  { %v2234_v8 = vpop.permute.xlu0 %2233 }
 0xfc1   :  { %v2236_v10 = vadd.f32 %v4308_v53, %v2234_v8  ;;  %v2328_v53 = vld [vmem:[#allocation4 + $0xa0] sm:$0xff] }
 0xfc2   :  { %v3871_v25 = vpack.c.bf16 %v2329_v23, %v2328_v53  ;;  %v2606_v53 = vld [vmem:[#allocation2 + $0xd0] sm:$0xff] }
 0xfc3   :  { %3982 = vtanh.f32 %v2236_v10 }
 0xfc4   :  { %3872 = vmatpush3.bf16.msra.mxu1 %v3871_v25  ;;  %v2607_v25 = vld [vmem:[#allocation2 + $0xd8] sm:$0xff] }
 0xfc5   :  { %3873 = vmatprep.subr.bf16.mxu1 %v4053_v1  ;;  %v3892_v27 = vpack.c.bf16 %v2607_v25, %v2606_v53  ;;  %v3042_v25 = vld [vmem:[#allocation4 + $0xe0] sm:$0xff] }
 0xfc8   :  { %v3981_v16 = vpop.eup %3980  ;;  %3875 = vmatpush3.bf16.msra.mxu1 %v3874_v29  ;;  %v2686_v29 = vld [vmem:[#allocation4 + $0xc8] sm:$0xff] }
 0xfc9   :  { %2211 = vrot.lane.b32.xlu1 %v3981_v16, %s4057_s1  ;;  %3882 = vmatprep.subr.bf16.mxu1 %v4053_v1 }
 0xfcd   :  { %v3983_v5 = vpop.eup %3982 }
 0xfce   :  { %2240 = vrot.lane.b32.xlu0 %v3983_v5, %s4057_s1  ;;  %v2605_v5 = vld [vmem:[#allocation2 + $0xc8] sm:$0xff] }
 0xfcf   :  { %v3889_v23 = vpack.c.bf16 %v2605_v5, %v2604_v45  ;;  %v2964_v5 = vld [vmem:[#allocation2 + $0xf8] sm:$0xff] }
0x103b   :  { %v2212_v30 = vpop.permute.xlu1 %2211 }
0x103c   :  { %v2214_v3 = vmul.f32 %v2212_v30, %v2209_v4  ;;  %v2687_v30 = vld [vmem:[#allocation4 + $0xd0] sm:$0xff] }
0x103e   :  { %v4541_v36 = vadd.f32 %v2215_v33, %v2214_v3  ;;  %v2688_v33 = vld [vmem:[#allocation4 + $0xd8] sm:$0xff] }
0x103f   :  { %v3898_v3 = vpack.c.bf16 %v2688_v33, %v2687_v30 }
0x1040   :  { %2252 = vrot.lane.b32.xlu1 %v4541_v36, %s4057_s1  ;;  %v2241_v7 = vpop.permute.xlu0 %2240 }
0x1041   :  { %v2243_v39 = vmul.f32 %v2241_v7, %v2238_v20 }
0x1043   :  { %v4546_v42 = vadd.f32 %v2244_v38, %v2243_v39 }
0x1045   :  { %v2333_v19 = vrot.slane %v4546_v42, 4 }
0x1047   :  { %2334 = vrot.lane.b32.xlu0 %v2333_v19, %s4057_s1 }
0x10b2   :  { %v2253_v41 = vpop.permute.xlu1 %2252 }
0x10b3   :  { %3623 = vmatmul.mubr.msk.f32.vlgmr.msra.gmra.mrb[28].mxu0 %vm122_vm1, %v2253_v41 }
0x10b4   :  { %3878 = vmatpush3.bf16.msra.mxu0 %v4153_v9  ;;  %3644 = vmatprep.mubr.msk.f32.mxu0 %vm4054_vm0, %v4055_v2 }
0x10b5   :  { %3879 = vmatprep.subr.bf16.mxu0 %v4053_v1 }
0x10b8   :  { %3881 = vmatpush3.bf16.msra.mxu0 %v4162_v12 }
0x10b9   :  { %v2335_v34 = vpop.permute.xlu0 %2334  ;;  %3888 = vmatprep.subr.bf16.mxu0 %v4053_v1 }
0x10ba   :  { %3634 = vmatmul.mubr.msk.f32.vlgmr.msra.gmra.mrb[24].mxu1 %vm122_vm1, %v2335_v34 }
0x10bb   :  { %3645 = vmatmul.mubr.msk.f32.vlgmr.msra.gmra.mrb[30].mxu0 %vm122_vm1, %v2253_v41  ;;  %3884 = vmatpush3.bf16.msra.mxu1 %v4185_v21 }
0x10bc   :  { %3885 = vmatprep.subr.bf16.mxu1 %v4053_v1  ;;  %3655 = vmatprep.mubr.msk.f32.mxu1 %vm4054_vm0, %v4055_v2 }
0x10bd   :  { %3666 = vmatprep.mubr.msk.f32.mxu0 %vm4054_vm0, %v4055_v2  ;;  %3890 = vmatpush3.bf16.msra.mxu0 %v3889_v23 }
0x10be   :  { %3891 = vmatprep.subr.bf16.mxu0 %v4053_v1 }
0x10bf   :  { %3887 = vmatpush3.bf16.msra.mxu1 %v4197_v24 }
0x10c0   :  { %3894 = vmatprep.subr.bf16.mxu1 %v4053_v1 }
0x10c1   :  { %3893 = vmatpush3.bf16.msra.mxu0 %v3892_v27  ;;  %v3043_v27 = vld [vmem:[#allocation4 + $0xe8] sm:$0xff] }
0x10c2   :  { %3656 = vmatmul.mubr.msk.f32.vlgmr.msra.gmra.mrb[26].mxu1 %vm122_vm1, %v2335_v34  ;;  %3900 = vmatprep.subr.bf16.mxu0 %v4053_v1 }
0x10c3   :  { %3677 = vmatprep.mubr.msk.f32.mxu1 %vm4054_vm0, %v4055_v2 }
0x1186   :  { %v2322_v35 = vpop.f32.mrb[28].mxu0 }
0x1187   :  { %v4571_v22 = vadd.f32 %v2322_v35, %v4519_v37  ;;  %v3624_v43 = vpop.f32.mrb[29].mxu0 }
0x118d   :  { %v2404_v26 = vpop.f32.mrb[24].mxu1 }
0x118e   :  { %v4574_v44 = vadd.f32 %v2404_v26, %v4522_v40  ;;  %v2475_v46 = vpop.f32.mrb[30].mxu0  ;;  %v3635_v14 = vpop.f32.mrb[25].mxu1 }
0x118f   :  { %v2549_v47 = vadd.f32 %v2475_v46, %v4314_v56  ;;  %v2554_v48 = vadd.f32 %v2475_v46, %v4226_v32  ;;  %v3646_v15 = vpop.f32.mrb[31].mxu0 }
0x1191   :  { %2556 = vrot.lane.b32.xlu1 %v2554_v48, %s4056_s28  ;;  %v2550_v40 = vmul.f32 0.5, %v2549_v47 }
0x1193   :  { %3984 = vtanh.f32 %v2550_v40 }
0x1195   :  { %v2545_v49 = vpop.f32.mrb[26].mxu1 }
0x1196   :  { %v2575_v57 = vrot.slane %v2545_v49, 4  ;;  %v2582_v58 = vadd.f32 %v2545_v49, %v4224_v31  ;;  %v3657_v37 = vpop.f32.mrb[27].mxu1 }
0x1198   :  { %v2577_v59 = vadd.f32 %v2575_v57, %v4314_v56  ;;  %v2584_v52 = vrot.slane %v2582_v58, 4 }
0x119a   :  { %2585 = vrot.lane.b32.xlu0 %v2584_v52, %s4056_s28  ;;  %v2578_v17 = vmul.f32 0.5, %v2577_v59 }
0x119c   :  { %3986 = vtanh.f32 %v2578_v17 }
0x119d   :  { %v3985_v60 = vpop.eup %3984 }
0x119e   :  { %v2552_v61 = vadd.f32 1.0, %v3985_v60 }
0x11a0   :  { %v2553_v62 = vmul.f32 0.5, %v2552_v61 }
0x11a2   :  { %v2566_v20 = vsub.f32 1.0, %v2553_v62  ;;  %v2572_v38 = vmul.f32 %v2553_v62, %v4541_v36 }
0x11a6   :  { %v3987_v18 = vpop.eup %3986 }
0x11a7   :  { %v2580_v6 = vadd.f32 1.0, %v3987_v18 }
0x11a9   :  { %v2581_v8 = vmul.f32 0.5, %v2580_v6 }
0x11ab   :  { %v2595_v41 = vsub.f32 1.0, %v2581_v8  ;;  %v2601_v35 = vmul.f32 %v2581_v8, %v4546_v42 }
0x1203   :  { %v2557_v63 = vpop.permute.xlu1 %2556 }
0x1204   :  { %v2559_v0 = vmul.f32 %v2557_v63, %v2553_v62 }
0x1206   :  { %2561 = vrot.lane.b32.xlu1 %v2559_v0, %s4056_s28 }
0x120c   :  { %v2586_v10 = vpop.permute.xlu0 %2585 }
0x120d   :  { %v2588_v51 = vmul.f32 %v2586_v10, %v2581_v8 }
0x120f   :  { %2590 = vrot.lane.b32.xlu0 %v2588_v51, %s4056_s28 }
0x1278   :  { %v2562_v11 = vpop.permute.xlu1 %2561 }
0x1279   :  { %v2564_v13 = vadd.f32 %v2562_v11, %v4314_v56 }
0x127b   :  { %3988 = vtanh.f32 %v2564_v13 }
0x1281   :  { %v2591_v16 = vpop.permute.xlu0 %2590 }
0x1282   :  { %v2593_v50 = vadd.f32 %v2591_v16, %v4314_v56  ;;  %v2685_v56 = vld [vmem:[#allocation4 + $0xc0] sm:$0xff] }
0x1283   :  { %v3895_v4 = vpack.c.bf16 %v2686_v29, %v2685_v56  ;;  %v2961_v16 = vld [vmem:[#allocation2 + $0xe0] sm:$0xff]  ;;  %v3045_v56 = vld [vmem:[#allocation4 + $0xf8] sm:$0xff] }
0x1284   :  { %3990 = vtanh.f32 %v2593_v50  ;;  %v2962_v50 = vld [vmem:[#allocation2 + $0xe8] sm:$0xff] }
0x1285   :  { %v3989_v54 = vpop.eup %3988  ;;  %3896 = vmatpush3.bf16.msra.mxu1 %v3895_v4  ;;  %v3913_v45 = vpack.c.bf16 %v2962_v50, %v2961_v16 }
0x1286   :  { %2568 = vrot.lane.b32.xlu1 %v3989_v54, %s4057_s1  ;;  %3897 = vmatprep.subr.bf16.mxu1 %v4053_v1  ;;  %v2963_v54 = vld [vmem:[#allocation2 + $0xf0] sm:$0xff] }
0x1287   :  { %v3916_v53 = vpack.c.bf16 %v2964_v5, %v2963_v54 }
0x1289   :  { %3899 = vmatpush3.bf16.msra.mxu1 %v3898_v3 }
0x128a   :  { %3906 = vmatprep.subr.bf16.mxu1 %v4053_v1 }
0x128e   :  { %v3991_v28 = vpop.eup %3990 }
0x128f   :  { %2597 = vrot.lane.b32.xlu0 %v3991_v28, %s4057_s1  ;;  %v3044_v28 = vld [vmem:[#allocation4 + $0xf0] sm:$0xff] }
0x1290   :  { %v3922_v29 = vpack.c.bf16 %v3045_v56, %v3044_v28 }
0x12f8   :  { %v2569_v7 = vpop.permute.xlu1 %2568 }
0x12f9   :  { %v2571_v39 = vmul.f32 %v2569_v7, %v2566_v20 }
0x12fb   :  { %v4593_v19 = vadd.f32 %v2572_v38, %v2571_v39 }
0x12fd   :  { %2609 = vrot.lane.b32.xlu1 %v4593_v19, %s4057_s1 }
0x1301   :  { %v2598_v34 = vpop.permute.xlu0 %2597 }
0x1302   :  { %v2600_v43 = vmul.f32 %v2598_v34, %v2595_v41 }
0x1304   :  { %v4598_v26 = vadd.f32 %v2601_v35, %v2600_v43 }
0x1306   :  { %v2690_v46 = vrot.slane %v4598_v26, 4 }
0x1308   :  { %2691 = vrot.lane.b32.xlu0 %v2690_v46, %s4057_s1 }
0x136f   :  { %v2610_v36 = vpop.permute.xlu1 %2609 }
0x1370   :  { %3667 = vmatmul.mubr.msk.f32.vlgmr.msra.gmra.mrb[32].mxu0 %vm122_vm1, %v2610_v36 }
0x1371   :  { %3902 = vmatpush3.bf16.msra.mxu0 %v4153_v9  ;;  %3688 = vmatprep.mubr.msk.f32.mxu0 %vm4054_vm0, %v4055_v2 }
0x1372   :  { %3903 = vmatprep.subr.bf16.mxu0 %v4053_v1 }
0x1375   :  { %3905 = vmatpush3.bf16.msra.mxu0 %v4162_v12 }
0x1376   :  { %3912 = vmatprep.subr.bf16.mxu0 %v4053_v1 }
0x1378   :  { %3689 = vmatmul.mubr.msk.f32.vlgmr.msra.gmra.mrb[34].mxu0 %vm122_vm1, %v2610_v36 }
0x1379   :  { %3710 = vmatprep.mubr.msk.f32.mxu0 %vm4054_vm0, %v4055_v2  ;;  %3914 = vmatpush3.bf16.msra.mxu0 %v3913_v45 }
0x137a   :  { %v2692_v42 = vpop.permute.xlu0 %2691  ;;  %3915 = vmatprep.subr.bf16.mxu0 %v4053_v1 }
0x137b   :  { %3678 = vmatmul.mubr.msk.f32.vlgmr.msra.gmra.mrb[28].mxu1 %vm122_vm1, %v2692_v42 }
0x137c   :  { %3908 = vmatpush3.bf16.msra.mxu1 %v4185_v21  ;;  %3699 = vmatprep.mubr.msk.f32.mxu1 %vm4054_vm0, %v4055_v2 }
0x137d   :  { %3909 = vmatprep.subr.bf16.mxu1 %v4053_v1  ;;  %3917 = vmatpush3.bf16.msra.mxu0 %v3916_v53 }
0x1380   :  { %3911 = vmatpush3.bf16.msra.mxu1 %v4197_v24 }
0x1381   :  { %3918 = vmatprep.subr.bf16.mxu1 %v4053_v1 }
0x1383   :  { %3700 = vmatmul.mubr.msk.f32.vlgmr.msra.gmra.mrb[30].mxu1 %vm122_vm1, %v2692_v42 }
0x1384   :  { %3721 = vmatprep.mubr.msk.f32.mxu1 %vm4054_vm0, %v4055_v2 }
0x1443   :  { %v2679_v9 = vpop.f32.mrb[32].mxu0 }
0x1444   :  { %v4623_v12 = vadd.f32 %v2679_v9, %v4571_v22  ;;  %v3668_v14 = vpop.f32.mrb[33].mxu0 }
0x144b   :  { %v2832_v21 = vpop.f32.mrb[34].mxu0 }
0x144c   :  { %v2906_v47 = vadd.f32 %v4312_v55, %v2832_v21  ;;  %v2911_v48 = vadd.f32 %v2832_v21, %v4226_v32  ;;  %v3690_v15 = vpop.f32.mrb[35].mxu0 }
0x144e   :  { %2913 = vrot.lane.b32.xlu1 %v2911_v48, %s4056_s28  ;;  %v2761_v24 = vpop.f32.mrb[28].mxu1  ;;  %v2907_v40 = vmul.f32 0.5, %v2906_v47 }
0x144f   :  { %v4629_v49 = vadd.f32 %v2761_v24, %v4574_v44  ;;  %v3679_v57 = vpop.f32.mrb[29].mxu1 }
0x1450   :  { %3992 = vtanh.f32 %v2907_v40 }
0x1456   :  { %v2902_v58 = vpop.f32.mrb[30].mxu1 }
0x1457   :  { %v2932_v2 = vrot.slane %v2902_v58, 4  ;;  %v2939_v37 = vadd.f32 %v2902_v58, %v4224_v31  ;;  %v3701_v22 = vpop.f32.mrb[31].mxu1 }
0x1459   :  { %v2934_v59 = vadd.f32 %v4312_v55, %v2932_v2  ;;  %v2941_v52 = vrot.slane %v2939_v37, 4 }
0x145a   :  { %v3993_v17 = vpop.eup %3992 }
0x145b   :  { %2942 = vrot.lane.b32.xlu0 %v2941_v52, %s4056_s28  ;;  %v2935_v32 = vmul.f32 0.5, %v2934_v59  ;;  %v2909_v60 = vadd.f32 1.0, %v3993_v17 }
0x145d   :  { %3994 = vtanh.f32 %v2935_v32  ;;  %v2910_v61 = vmul.f32 0.5, %v2909_v60 }
0x145f   :  { %v2923_v4 = vsub.f32 1.0, %v2910_v61  ;;  %v2929_v33 = vmul.f32 %v2910_v61, %v4593_v19 }
0x1467   :  { %v3995_v63 = vpop.eup %3994 }
0x1468   :  { %v2937_v18 = vadd.f32 1.0, %v3995_v63 }
0x146a   :  { %v2938_v31 = vmul.f32 0.5, %v2937_v18 }
0x146c   :  { %v2952_v7 = vsub.f32 1.0, %v2938_v31  ;;  %v2958_v39 = vmul.f32 %v2938_v31, %v4598_v26  ;;  %v3124_v26 = vld [vmem:[%s4664_s8] sm:$0xf] }
0x14c0   :  { %v2914_v44 = vpop.permute.xlu1 %2913 }
0x14c1   :  { %v2916_v62 = vmul.f32 %v2914_v44, %v2910_v61 }
0x14c3   :  { %2918 = vrot.lane.b32.xlu1 %v2916_v62, %s4056_s28 }
0x14cd   :  { %v2943_v0 = vpop.permute.xlu0 %2942 }
0x14ce   :  { %v2945_v6 = vmul.f32 %v2943_v0, %v2938_v31 }
0x14d0   :  { %2947 = vrot.lane.b32.xlu0 %v2945_v6, %s4056_s28 }
0x1535   :  { %v2919_v8 = vpop.permute.xlu1 %2918 }
0x1536   :  { %v2921_v10 = vadd.f32 %v4312_v55, %v2919_v8 }
0x1538   :  { %3996 = vtanh.f32 %v2921_v10 }
0x1542   :  { %v3997_v51 = vpop.eup %3996  ;;  %v2948_v11 = vpop.permute.xlu0 %2947 }
0x1543   :  { %v2950_v13 = vadd.f32 %v4312_v55, %v2948_v11  ;;  %2925 = vrot.lane.b32.xlu1 %v3997_v51, %s4057_s1  ;;  %v3919_v55 = vpack.c.bf16 %v3043_v27, %v3042_v25 }
0x1545   :  { %3998 = vtanh.f32 %v2950_v13  ;;  %3920 = vmatpush3.bf16.msra.mxu1 %v3919_v55 }
0x1546   :  { %3921 = vmatprep.subr.bf16.mxu1 %v4053_v1 }
0x1549   :  { %3923 = vmatpush3.bf16.msra.mxu1 %v3922_v29 }
0x154f   :  { %v3999_v23 = vpop.eup %3998 }
0x1550   :  { %2954 = vrot.lane.b32.xlu0 %v3999_v23, %s4057_s1 }
0x15b5   :  { %v2926_v30 = vpop.permute.xlu1 %2925 }
0x15b6   :  { %v2928_v3 = vmul.f32 %v2926_v30, %v2923_v4 }
0x15b8   :  { %v2930_v20 = vadd.f32 %v2929_v33, %v2928_v3 }
0x15ba   :  { %2966 = vrot.lane.b32.xlu0 %v2930_v20, %s4057_s1 }
0x15c2   :  { %v2955_v38 = vpop.permute.xlu0 %2954 }
0x15c3   :  { %v2957_v41 = vmul.f32 %v2955_v38, %v2952_v7 }
0x15c5   :  { %v2959_v34 = vadd.f32 %v2958_v39, %v2957_v41 }
0x15c7   :  { %v3047_v35 = vrot.slane %v2959_v34, 4 }
0x15c9   :  { %3048 = vrot.lane.b32.xlu1 %v3047_v35, %s4057_s1 }
0x162c   :  { %v2967_v43 = vpop.permute.xlu0 %2966 }
0x162d   :  { %3711 = vmatmul.mubr.msk.f32.vlgmr.msra.gmra.mrb[36].mxu0 %vm122_vm1, %v2967_v43 }
0x163b   :  { %v3049_v1 = vpop.permute.xlu1 %3048 }
0x163c   :  { %3722 = vmatmul.mubr.msk.f32.vlgmr.msra.gmra.mrb[32].mxu1 %vm122_vm1, %v3049_v1 }
0x1700   :  { %v3036_v19 = vpop.f32.mrb[36].mxu0 }
0x1701   :  { %v3040_v46 = vadd.f32 %v3036_v19, %v4623_v12  ;;  %v3712_v36 = vpop.f32.mrb[37].mxu0 }
0x170f   :  { %v3118_v42 = vpop.f32.mrb[32].mxu1 }
0x1710   :  { %v3122_v9 = vadd.f32 %v3118_v42, %v4629_v49  ;;  %v3723_v14 = vpop.f32.mrb[33].mxu1 }
0x1712   :  { %v3123_v21 = vadd.f32 %v3122_v9, %v3040_v46 }
0x1714   :  { %v3125_v47 = vadd.f32 %v3124_v26, %v3123_v21 }
0x1716   :  { %3127 = vst.msk [vmem:[%s4665_s9] sm:$0xf] %vm3126_vm10, %v3125_v47 }
0x1717   :  { %3132 = vsyncpa [#allocation3], 1 }
0x1718   :  { %3133 = vsyncpa [#allocation5], 1 }

</bundles_post_ra>
